<compile_context>
chip_gen: v7x
topology: tpu7x:2x2x1
jax: 0.10.0
libtpu: 0.0.40
codegen_flags: <defaults>
</compile_context>

<pallas_src>
import jax
import jax.numpy as jnp
from jax.experimental import pallas as pl
from jax.experimental.pallas import tpu as pltpu

MAX_ATOMS = 100
EMB_DIM = 8
SPATIAL_DIM = 16
VOCAB_PAD = 128  # embedding table padded to 128 rows (lane-aligned, Z < 100 always)


def baseline_kernel(z_ref, r_ref, seg_ref, embc_ref, w1t_ref, b1t_ref, w2c_ref,
                    out_ref):
    # out block is resident across the (arbitrary) atom-tile axis -> accumulator.
    @pl.when(pl.program_id(1) == 0)
    def _init():
        out_ref[...] = jnp.zeros_like(out_ref)

    ta = z_ref.shape[1]      # atoms per tile (lane axis)
    bp = out_ref.shape[1]    # padded number of molecules (lane axis)

    # --- embedding lookup (combiner already folded into emb_c) -------------
    # gather emb_c[z] via iota-compare + sublane reduce: no HBM one-hot.
    z = z_ref[...]                                                    # [1, ta] int32
    v_iota = jax.lax.broadcasted_iota(jnp.int32, (VOCAB_PAD, ta), 0)  # [128, ta]
    ez = jnp.sum(jnp.where(v_iota == z, embc_ref[...], 0.0),
                 axis=0, keepdims=True)                               # [1, ta]

    # --- spatial MLP, atoms on lanes ----------------------------------------
    # h = relu(w1^T @ R^T + b1); K=3 contraction done as 3 broadcast FMAs (VPU).
    r = r_ref[...]                                                    # [3, ta]
    w1t = w1t_ref[...]                                                # [16, 3]
    h = (w1t[:, 0:1] * r[0:1, :]
         + w1t[:, 1:2] * r[1:2, :]
         + w1t[:, 2:3] * r[2:3, :]
         + b1t_ref[...])                                              # [16, ta]
    h = jnp.maximum(h, 0.0)
    # second Linear + combiner folded: ysp = (w2 @ wcs)^T @ h
    ysp = jnp.sum(w2c_ref[...] * h, axis=0, keepdims=True)            # [1, ta]

    y = ez + ysp                                                      # [1, ta]

    # --- per-molecule sum: in-kernel segment one-hot, molecules lane-dense ---
    seg = seg_ref[...]                                                # [ta, 1] int32 (-1 for pad atoms)
    m_iota = jax.lax.broadcasted_iota(jnp.int32, (ta, bp), 1)         # [ta, bp]
    seg_oh = (seg == m_iota).astype(jnp.float32)                      # [ta, bp]
    # Broadcast y to 8 rows so the MXU sees a tile-aligned M; all 8 rows of the
    # accumulator hold the same partial sum.
    y8 = jnp.broadcast_to(y, (8, ta))                                 # [8, ta]
    out_ref[...] += jnp.dot(y8, seg_oh,
                            preferred_element_type=jnp.float32)       # [8, bp]


def init_params(key):
    k = jax.random.split(key, 6)
    emb = jax.random.normal(k[0], (MAX_ATOMS, EMB_DIM), jnp.float32) * 0.1
    w1 = jax.random.normal(k[1], (3, SPATIAL_DIM), jnp.float32) * 0.1
    b1 = jax.random.normal(k[2], (1, SPATIAL_DIM), jnp.float32) * 0.1
    w2 = jax.random.normal(k[3], (SPATIAL_DIM, SPATIAL_DIM), jnp.float32) * 0.1
    b2 = jax.random.normal(k[4], (1, SPATIAL_DIM), jnp.float32) * 0.1
    w_comb = jax.random.normal(k[5], (EMB_DIM + SPATIAL_DIM, 1), jnp.float32) * 0.1
    return dict(emb=emb, w1=w1, b1=b1, w2=w2, b2=b2,
                wce=w_comb[:EMB_DIM], wcs=w_comb[EMB_DIM:])


def _fold_params(params):
    """Constant-fold the bias-free combiner into the preceding linear maps."""
    b2c = (params["b2"] @ params["wcs"])[0, 0]                        # scalar
    emb_c = (params["emb"] @ params["wce"])[:, 0] + b2c               # [100]
    emb_c = jnp.pad(emb_c, (0, VOCAB_PAD - MAX_ATOMS)).reshape(VOCAB_PAD, 1)
    w1t = params["w1"].T                                              # [16, 3]
    b1t = params["b1"].reshape(SPATIAL_DIM, 1)                        # [16, 1]
    w2c = params["w2"] @ params["wcs"]                                # [16, 1]
    return emb_c, w1t, b1t, w2c


def baseline_forward(params, Z, R, n_atoms, *, tile_atoms=512, n_cores=2):
    """Z: [A] int32 atomic numbers; R: [A, 3] float32 positions;
    n_atoms: [B] int32 atoms-per-molecule with sum == A (mismatched sums are
    silently truncated/padded by total_repeat_length, as in the original)."""
    A = Z.shape[0]
    B = n_atoms.shape[0]
    Bp = ((B + 127) // 128) * 128                 # lane-dense molecule axis
    blocks_per_core = max(1, -(-A // (n_cores * tile_atoms)))
    A_pad = n_cores * blocks_per_core * tile_atoms

    emb_c, w1t, b1t, w2c = _fold_params(params)

    # Layout plumbing (plain JAX, cheap): atoms-on-lanes operands, padded to A_pad.
    z_row = jnp.pad(Z.astype(jnp.int32), (0, A_pad - A)).reshape(1, A_pad)
    r_t = jnp.pad(R.astype(jnp.float32), ((0, A_pad - A), (0, 0))).T          # [3, A_pad]
    seg_ids = jnp.repeat(jnp.arange(B, dtype=jnp.int32), n_atoms,
                         total_repeat_length=A)                               # [A]
    seg_col = jnp.pad(seg_ids, (0, A_pad - A),
                      constant_values=-1).reshape(A_pad, 1)                   # pad atoms -> no molecule

    def col_map(c, i):  # [*, A_pad] operands
        return (0, c * blocks_per_core + i)

    def row_map(c, i):  # [A_pad, *] operands
        return (c * blocks_per_core + i, 0)

    def const_map(c, i):  # resident weights
        return (0, 0)

    out = pl.pallas_call(
        baseline_kernel,
        out_shape=jax.ShapeDtypeStruct((n_cores * 8, Bp), jnp.float32),
        grid=(n_cores, blocks_per_core),
        in_specs=[
            pl.BlockSpec((1, tile_atoms), col_map),         # Z (int32, lanes)
            pl.BlockSpec((3, tile_atoms), col_map),         # R^T
            pl.BlockSpec((tile_atoms, 1), row_map),         # segment ids (sublanes)
            pl.BlockSpec((VOCAB_PAD, 1), const_map),        # folded embedding column
            pl.BlockSpec((SPATIAL_DIM, 3), const_map),      # w1^T
            pl.BlockSpec((SPATIAL_DIM, 1), const_map),      # b1 column
            pl.BlockSpec((SPATIAL_DIM, 1), const_map),      # w2 @ wcs column
        ],
        out_specs=pl.BlockSpec((8, Bp), lambda c, i: (c, 0)),
        compiler_params=pltpu.CompilerParams(
            dimension_semantics=("parallel", "arbitrary"),
            vmem_limit_bytes=32 * 1024 * 1024,
        ),
    )(z_row, r_t, seg_col, emb_c, w1t, b1t, w2c)

    # Row 0 of each core's 8-row block holds that core's partial sum.
    return out[::8, :B].sum(axis=0)                                           # [B]


def baseline_reference(params, Z, R, n_atoms):
    emb = params["emb"][Z]                                                    # [A, E]
    h = jnp.maximum(R @ params["w1"] + params["b1"], 0.0)
    p = h @ params["w2"] + params["b2"]
    y = (emb @ params["wce"] + p @ params["wcs"])[:, 0]                       # [A]
    seg_ids = jnp.repeat(jnp.arange(n_atoms.shape[0]), n_atoms,
                         total_repeat_length=Z.shape[0])
    return jax.ops.segment_sum(y, seg_ids, num_segments=n_atoms.shape[0])


if __name__ == "__main__":
    key = jax.random.PRNGKey(0)
    kp, kz, kr = jax.random.split(key, 3)
    params = init_params(kp)

    # batch of 2 molecules with 3 and 5 atoms -> 8 atoms total
    n_atoms = jnp.array([3, 5], dtype=jnp.int32)
    A = int(n_atoms.sum())
    Z = jax.random.randint(kz, (A,), 0, MAX_ATOMS, dtype=jnp.int32)
    R = jax.random.normal(kr, (A, 3), jnp.float32)

    out = jax.block_until_ready(baseline_forward(params, Z, R, n_atoms))
    ref = baseline_reference(params, Z, R, n_atoms)

    assert out.shape == (2,)
    assert jnp.allclose(out, ref, atol=1e-4, rtol=1e-4), (out, ref)
    print("KERNEL_OK")
</pallas_src>

<mosaic_0001>
module attributes {stable_mosaic.version = 11 : i64} {
  func.func @baseline_kernel(%arg0: i32, %arg1: i32, %arg2: memref<1x512xi32, #tpu.memory_space<vmem>>, %arg3: memref<3x512xf32, #tpu.memory_space<vmem>>, %arg4: memref<512x1xi32, #tpu.memory_space<vmem>>, %arg5: memref<128x1xf32, #tpu.memory_space<vmem>>, %arg6: memref<16x3xf32, #tpu.memory_space<vmem>>, %arg7: memref<16x1xf32, #tpu.memory_space<vmem>>, %arg8: memref<16x1xf32, #tpu.memory_space<vmem>>, %arg9: memref<8x128xf32, #tpu.memory_space<vmem>>) attributes {dimension_semantics = [#tpu.dimension_semantics<parallel>, #tpu.dimension_semantics<arbitrary>], iteration_bounds = array<i64: 2, 1>, scalar_prefetch = 0 : i64, scratch_operands = 0 : i64, tpu.core_type = #tpu.core_type<tc>, window_params = [{transform_indices = @transform_0, window_bounds = array<i64: 1, 512>}, {transform_indices = @transform_1, window_bounds = array<i64: 3, 512>}, {transform_indices = @transform_2, window_bounds = array<i64: 512, 1>}, {pipeline_mode = #tpu.pipeline_mode<synchronous>, transform_indices = @transform_3, window_bounds = array<i64: 128, 1>}, {pipeline_mode = #tpu.pipeline_mode<synchronous>, transform_indices = @transform_4, window_bounds = array<i64: 16, 3>}, {pipeline_mode = #tpu.pipeline_mode<synchronous>, transform_indices = @transform_5, window_bounds = array<i64: 16, 1>}, {pipeline_mode = #tpu.pipeline_mode<synchronous>, transform_indices = @transform_6, window_bounds = array<i64: 16, 1>}, {transform_indices = @transform_7, window_bounds = array<i64: 8, 128>}]} {
    %c0_i32 = arith.constant 0 : i32
    %0 = arith.cmpi eq, %arg1, %c0_i32 : i32
    %1 = arith.extui %0 : i1 to i32
    %c0_i32_0 = arith.constant 0 : i32
    %2 = arith.cmpi ne, %1, %c0_i32_0 : i32
    scf.if %2 {
      %cst_22 = arith.constant 0.000000e+00 : f32
      %56 = vector.broadcast %cst_22 : f32 to vector<8x128xf32>
      %c0_23 = arith.constant 0 : index
      %c0_24 = arith.constant 0 : index
      %57 = vector.load %arg9[%c0_23, %c0_24] : memref<8x128xf32, #tpu.memory_space<vmem>>, vector<8x128xf32>
      tpu.vector_store %arg9[%c0_23, %c0_24], %56 {strides = array<i32>} : memref<8x128xf32, #tpu.memory_space<vmem>>, vector<8x128xf32>,
    } else {
    }
    %c0 = arith.constant 0 : index
    %c0_1 = arith.constant 0 : index
    %3 = vector.load %arg2[%c0, %c0_1] : memref<1x512xi32, #tpu.memory_space<vmem>>, vector<1x512xi32>
    %4 = tpu.iota {dimensions = array<i32: 0>} : vector<128x512xi32>
    %5 = vector.broadcast %3 : vector<1x512xi32> to vector<128x512xi32>
    %6 = arith.cmpi eq, %4, %5 : vector<128x512xi32>
    %c0_2 = arith.constant 0 : index
    %c0_3 = arith.constant 0 : index
    %7 = vector.load %arg5[%c0_2, %c0_3] : memref<128x1xf32, #tpu.memory_space<vmem>>, vector<128x1xf32>
    %cst = arith.constant 0.000000e+00 : f32
    %8 = vector.shape_cast %7 : vector<128x1xf32> to vector<128x1xf32>
    %9 = vector.broadcast %8 : vector<128x1xf32> to vector<128x512xf32>
    %10 = vector.broadcast %cst : f32 to vector<128x512xf32>
    %11 = arith.select %6, %9, %10 : vector<128x512xi1>, vector<128x512xf32>
    %cst_4 = arith.constant dense<0.000000e+00> : vector<512xf32>
    %12 = vector.multi_reduction <add>, %11, %cst_4 [0] : vector<128x512xf32> to vector<512xf32>
    %13 = vector.shape_cast %12 : vector<512xf32> to vector<1x512xf32>
    %c0_5 = arith.constant 0 : index
    %c0_6 = arith.constant 0 : index
    %14 = vector.load %arg3[%c0_5, %c0_6] : memref<3x512xf32, #tpu.memory_space<vmem>>, vector<3x512xf32>
    %c0_7 = arith.constant 0 : index
    %c0_8 = arith.constant 0 : index
    %15 = vector.load %arg6[%c0_7, %c0_8] : memref<16x3xf32, #tpu.memory_space<vmem>>, vector<16x3xf32>
    %16 = vector.extract_strided_slice %15 {offsets = [0, 0], sizes = [16, 1], strides = [1, 1]} : vector<16x3xf32> to vector<16x1xf32>
    %17 = vector.extract_strided_slice %14 {offsets = [0, 0], sizes = [1, 512], strides = [1, 1]} : vector<3x512xf32> to vector<1x512xf32>
    %18 = vector.broadcast %16 : vector<16x1xf32> to vector<16x512xf32>
    %19 = vector.broadcast %17 : vector<1x512xf32> to vector<16x512xf32>
    %20 = arith.mulf %18, %19 : vector<16x512xf32>
    %21 = vector.extract_strided_slice %15 {offsets = [0, 1], sizes = [16, 1], strides = [1, 1]} : vector<16x3xf32> to vector<16x1xf32>
    %22 = vector.extract_strided_slice %14 {offsets = [1, 0], sizes = [1, 512], strides = [1, 1]} : vector<3x512xf32> to vector<1x512xf32>
    %23 = vector.broadcast %21 : vector<16x1xf32> to vector<16x512xf32>
    %24 = vector.broadcast %22 : vector<1x512xf32> to vector<16x512xf32>
    %25 = arith.mulf %23, %24 : vector<16x512xf32>
    %26 = arith.addf %20, %25 : vector<16x512xf32>
    %27 = vector.extract_strided_slice %15 {offsets = [0, 2], sizes = [16, 1], strides = [1, 1]} : vector<16x3xf32> to vector<16x1xf32>
    %28 = vector.extract_strided_slice %14 {offsets = [2, 0], sizes = [1, 512], strides = [1, 1]} : vector<3x512xf32> to vector<1x512xf32>
    %29 = vector.broadcast %27 : vector<16x1xf32> to vector<16x512xf32>
    %30 = vector.broadcast %28 : vector<1x512xf32> to vector<16x512xf32>
    %31 = arith.mulf %29, %30 : vector<16x512xf32>
    %32 = arith.addf %26, %31 : vector<16x512xf32>
    %c0_9 = arith.constant 0 : index
    %c0_10 = arith.constant 0 : index
    %33 = vector.load %arg7[%c0_9, %c0_10] : memref<16x1xf32, #tpu.memory_space<vmem>>, vector<16x1xf32>
    %34 = vector.broadcast %33 : vector<16x1xf32> to vector<16x512xf32>
    %35 = arith.addf %32, %34 : vector<16x512xf32>
    %cst_11 = arith.constant 0.000000e+00 : f32
    %36 = vector.broadcast %cst_11 : f32 to vector<16x512xf32>
    %37 = arith.maximumf %35, %36 : vector<16x512xf32>
    %c0_12 = arith.constant 0 : index
    %c0_13 = arith.constant 0 : index
    %38 = vector.load %arg8[%c0_12, %c0_13] : memref<16x1xf32, #tpu.memory_space<vmem>>, vector<16x1xf32>
    %39 = vector.broadcast %38 : vector<16x1xf32> to vector<16x512xf32>
    %40 = arith.mulf %39, %37 : vector<16x512xf32>
    %cst_14 = arith.constant dense<0.000000e+00> : vector<512xf32>
    %41 = vector.multi_reduction <add>, %40, %cst_14 [0] : vector<16x512xf32> to vector<512xf32>
    %42 = vector.shape_cast %41 : vector<512xf32> to vector<1x512xf32>
    %43 = arith.addf %13, %42 : vector<1x512xf32>
    %c0_15 = arith.constant 0 : index
    %c0_16 = arith.constant 0 : index
    %44 = vector.load %arg4[%c0_15, %c0_16] : memref<512x1xi32, #tpu.memory_space<vmem>>, vector<512x1xi32>
    %45 = tpu.iota {dimensions = array<i32: 1>} : vector<512x128xi32>
    %46 = vector.broadcast %44 : vector<512x1xi32> to vector<512x128xi32>
    %47 = arith.cmpi eq, %46, %45 : vector<512x128xi32>
    %48 = arith.extui %47 : vector<512x128xi1> to vector<512x128xi32>
    %49 = arith.sitofp %48 : vector<512x128xi32> to vector<512x128xf32>
    %50 = vector.shape_cast %43 : vector<1x512xf32> to vector<1x512xf32>
    %51 = vector.broadcast %50 : vector<1x512xf32> to vector<8x512xf32>
    %c0_17 = arith.constant 0 : index
    %c0_18 = arith.constant 0 : index
    %52 = vector.load %arg9[%c0_17, %c0_18] : memref<8x128xf32, #tpu.memory_space<vmem>>, vector<8x128xf32>
    %cst_19 = arith.constant dense<0.000000e+00> : vector<8x128xf32>
    %53 = tpu.matmul %51, %49, %cst_19 {dimension_numbers = #tpu.dot_dimension_numbers<[1], [0], [0], [1], [0, 0, 1, 1], [], []>} : vector<8x512xf32>, vector<512x128xf32>, vector<8x128xf32> -> vector<8x128xf32>
    %54 = arith.addf %52, %53 : vector<8x128xf32>
    %c0_20 = arith.constant 0 : index
    %c0_21 = arith.constant 0 : index
    %55 = vector.load %arg9[%c0_20, %c0_21] : memref<8x128xf32, #tpu.memory_space<vmem>>, vector<8x128xf32>
    tpu.vector_store %arg9[%c0_20, %c0_21], %54 {strides = array<i32>} : memref<8x128xf32, #tpu.memory_space<vmem>>, vector<8x128xf32>,
    return
  }
  func.func @transform_0(%arg0: i32, %arg1: i32) -> (i32, i32) {
    %c1_i32 = arith.constant 1 : i32
    %0 = arith.muli %arg0, %c1_i32 : i32
    %1 = arith.addi %0, %arg1 : i32
    %c0_i32 = arith.constant 0 : i32
    %c0_i32_0 = arith.constant 0 : i32
    return %c0_i32, %1 : i32, i32
  }
  func.func @transform_1(%arg0: i32, %arg1: i32) -> (i32, i32) {
    %c1_i32 = arith.constant 1 : i32
    %0 = arith.muli %arg0, %c1_i32 : i32
    %1 = arith.addi %0, %arg1 : i32
    %c0_i32 = arith.constant 0 : i32
    %c0_i32_0 = arith.constant 0 : i32
    return %c0_i32, %1 : i32, i32
  }
  func.func @transform_2(%arg0: i32, %arg1: i32) -> (i32, i32) {
    %c1_i32 = arith.constant 1 : i32
    %0 = arith.muli %arg0, %c1_i32 : i32
    %1 = arith.addi %0, %arg1 : i32
    %c0_i32 = arith.constant 0 : i32
    %c0_i32_0 = arith.constant 0 : i32
    return %1, %c0_i32 : i32, i32
  }
  func.func @transform_3(%arg0: i32, %arg1: i32) -> (i32, i32) {
    %c0_i32 = arith.constant 0 : i32
    %c0_i32_0 = arith.constant 0 : i32
    %c0_i32_1 = arith.constant 0 : i32
    return %c0_i32, %c0_i32_0 : i32, i32
  }
  func.func @transform_4(%arg0: i32, %arg1: i32) -> (i32, i32) {
    %c0_i32 = arith.constant 0 : i32
    %c0_i32_0 = arith.constant 0 : i32
    %c0_i32_1 = arith.constant 0 : i32
    return %c0_i32, %c0_i32_0 : i32, i32
  }
  func.func @transform_5(%arg0: i32, %arg1: i32) -> (i32, i32) {
    %c0_i32 = arith.constant 0 : i32
    %c0_i32_0 = arith.constant 0 : i32
    %c0_i32_1 = arith.constant 0 : i32
    return %c0_i32, %c0_i32_0 : i32, i32
  }
  func.func @transform_6(%arg0: i32, %arg1: i32) -> (i32, i32) {
    %c0_i32 = arith.constant 0 : i32
    %c0_i32_0 = arith.constant 0 : i32
    %c0_i32_1 = arith.constant 0 : i32
    return %c0_i32, %c0_i32_0 : i32, i32
  }
  func.func @transform_7(%arg0: i32, %arg1: i32) -> (i32, i32) {
    %c0_i32 = arith.constant 0 : i32
    %c0_i32_0 = arith.constant 0 : i32
    return %arg0, %c0_i32 : i32, i32
  }
}

</mosaic_0001>

<bundles_post_ra>
// kernel: tpu_custom_call.1
= control target key start
LH: loop header
LB: loop body
LE: loop exit
PB: predicated region body
PF: predicated region fallthrough
CT: control target
= control target key end

     0   :  { %12 = vsyncpa [#allocation3], 0  ;;  %s3071_s0 = inlined_call_operand.vmem [shape: s32[1,1024], index: 0, kind: input, shape index: {}]   ;;  %s3072_s1 = inlined_call_operand.vmem [shape: f32[3,1024], index: 1, kind: input, shape index: {}]   ;;  %s3073_s2 = inlined_call_operand.vmem [shape: s32[1024,1], index: 2, kind: input, shape index: {}]   ;;  %s3074_s3 = inlined_call_operand.vmem [shape: f32[128,1], index: 3, kind: input, shape index: {}]   ;;  %s3075_s4 = inlined_call_operand.vmem [shape: f32[16,3], index: 4, kind: input, shape index: {}]   ;;  %s3076_s5 = inlined_call_operand.vmem [shape: f32[16,1], index: 5, kind: input, shape index: {}]   ;;  %s3077_s6 = inlined_call_operand.vmem [shape: f32[16,1], index: 6, kind: input, shape index: {}]   ;;  %s3078_s7 = inlined_call_operand.hbm [shape: f32[16,128], index: 7, kind: output, shape index: {}]  }
   0x1   :  { %14 = vsyncpa [#allocation3 + $0x1], 0  ;;  %s2125_s24 = smov 0   ;;  %s2127_s25 = smov 0  }
   0x2   :  { %s2129_s26 = smov 0   ;;  %s2131_s27 = smov 0  }
   0x3   :  { %s2133_s28 = smov 0   ;;  %s2135_s29 = smov 0  }
   0x4 LB: > { %s1655_s30 = sadd.s32 4294967295, %s2078_s29   ;;  %s1656_s8 = sadd.s32 4294967294, %s2078_s29   ;;  %s2078_s29 = sphi %s2135_s29, %s20_s29   ;;  %s2074_s28 = sphi %s2133_s28, %s3101_s28   ;;  %s2070_s27 = sphi %s2131_s27, %s3100_s27   ;;  %s2066_s26 = sphi %s2129_s26, %s3099_s26   ;;  %s2062_s25 = sphi %s2127_s25, %s3098_s25   ;;  %s2058_s24 = sphi %s2125_s24, %s3097_s24  }
   0x5   : > { %s32_s9 = sadd.s32 1, %s2074_s28  ;;  %s207_s10 = sadd.s32 1, %s2066_s26 }
   0x6   : > { %p34_p0 = scmp.ge.s32.totalorder %s32_s9, 2  ;;  %p217_p1 = scmp.ne.s32.totalorder %s2066_s26, %s2062_s25 }
   0x7   : > { %p218_p2 = scmp.eq.s32.totalorder %s1655_s30, 1  ;;  %p223_p3 = scmp.ne.s32.totalorder %s2062_s25, %s2058_s24 }
   0x8   : > { %s3103_s9 = smov (%p34_p0, %s32_s9), 0  ;;  %p224_p5 = scmp.eq.s32.totalorder %s1656_s8, 1 }
   0x9   : > { %p2165_p4 = por %p218_p2, %p217_p1  ;;  %s204_s12 = ssub.s32 %s2074_s28, %s3103_s9 }
   0xa   : > { %p1659_p6 = scmp.ge.s32.totalorder %s2078_s29, 1  ;;  %p205_p7 = scmp.eq.s32.totalorder %s204_s12, 0 }
   0xb   : > { %p2172_p8 = por %p224_p5, %p223_p3  ;;  %p286_p9 = scmp.lt.s32.totalorder %s2078_s29, 3 }
   0xc   : > { %s2178_s14 = scalar_select %p205_p7, %s2066_s26, %s207_s10  }
   0xd   : > { %p287_p10 = pnand %p1659_p6, %p286_p9 }
   0xe   : > { %v2183_v0 = vld [vmem:[%s3075_s4 + $0x8] sm:$0xff] (!%p287_p10)  ;;  %v458_v1 = vld [vmem:[%s3074_s3 + $0x10] sm:$0xff] (!%p287_p10)  ;;  %v2080_v2 = vmov (!%p287_p10), 1   ;;  %v2081_v3 = vmov (!%p287_p10), 0   ;;  %s1664_s19 = sshll.u32 (!%p287_p10), %s2070_s27, 6  ;;  %v459_v4 = vld [vmem:[%s3074_s3 + $0x18] sm:$0xff] (!%p287_p10)  ;;  %v359_v56 = vlaneseq (!%p287_p10) }
   0xf   : > { %290 = sbr.rel (%p287_p10) target bundleno = 568 (0x238), region = 48  ;;  %1994 = vset.pattern.permute.xlu0 (!%p287_p10), %v2080_v2  ;;  %1992 = vset.pattern.permute.xlu1 (!%p287_p10), %v2081_v3  ;;  %p347_p11 = scmp.lt.s32.totalorder (!%p287_p10), %s1664_s19, 127  ;;  %v2082_v5 = vmov (!%p287_p10), 2   ;;  %v461_v6 = vld [vmem:[%s3074_s3 + $0x28] sm:$0xff] (!%p287_p10)  ;;  %v456_v7 = vld [vmem:[%s3074_s3] sm:$0xff] (!%p287_p10)  ;;  %v463_v8 = vld [vmem:[%s3074_s3 + $0x38] sm:$0xff] (!%p287_p10) }
  0x10   : > { %765 = vperm.xlu0 (!%p287_p10), %1994, %v2183_v0   ;;  %484 = vperm.xlu1 (!%p287_p10), %1992, %v458_v1   ;;  %v457_v9 = vld [vmem:[%s3074_s3 + $0x8] sm:$0xff] (!%p287_p10)  ;;  %v460_v11 = vld [vmem:[%s3074_s3 + $0x20] sm:$0xff] (!%p287_p10)  ;;  %v462_v13 = vld [vmem:[%s3074_s3 + $0x30] sm:$0xff] (!%p287_p10)  ;;  %s1661_s30 = sshll.u32 (!%p287_p10), %s2070_s27, 2  ;;  %v2293_v59 = vshrl.u32 (!%p287_p10), %v359_v56, 7 }
  0x11   : > { %v465_v10 = vld [vmem:[%s3074_s3 + $0x48] sm:$0xff] (!%p287_p10)  ;;  %v464_v15 = vld [vmem:[%s3074_s3 + $0x40] sm:$0xff] (!%p287_p10)  ;;  %v466_v17 = vld [vmem:[%s3074_s3 + $0x50] sm:$0xff] (!%p287_p10)  ;;  %p332_p12 = scmp.lt.s32.totalorder (!%p287_p10), %s1661_s30, 7 }
  0x12   : > { %v702_v24 = vld [vmem:[%s3075_s4] sm:$0xff] (!%p287_p10)  ;;  %v467_v34 = vld [vmem:[%s3074_s3 + $0x58] sm:$0xff] (!%p287_p10)  ;;  %v881_v39 = vld [vmem:[%s3076_s5 + $0x8] sm:$0xff] (!%p287_p10) }
  0x13   : > { %v468_v37 = vld [vmem:[%s3074_s3 + $0x60] sm:$0xff] (!%p287_p10)  ;;  %v469_v48 = vld [vmem:[%s3074_s3 + $0x68] sm:$0xff] (!%p287_p10)  ;;  %v470_v49 = vld [vmem:[%s3074_s3 + $0x70] sm:$0xff] (!%p287_p10) }
  0x14   : > { %1997 = vset.pattern.permute.xlu0 (!%p287_p10), %v2082_v5  ;;  %489 = vperm.xlu1 (!%p287_p10), %1992, %v459_v4   ;;  %v880_v46 = vld [vmem:[%s3076_s5] sm:$0xff] (!%p287_p10)  ;;  %v909_v51 = vld [vmem:[%s3077_s6 + $0x8] sm:$0xff] (!%p287_p10)  ;;  %v471_v1 = vld [vmem:[%s3074_s3 + $0x78] sm:$0xff] (!%p287_p10) }
  0x15   : > { %825 = vperm.xlu0 (!%p287_p10), %1997, %v2183_v0   ;;  %v908_v60 = vld [vmem:[%s3077_s6] sm:$0xff] (!%p287_p10) }
  0x16   : > { %s3105_s19 = smov (!%p347_p11, %s1664_s19), 127  ;;  %s3107_s30 = smov (!%p332_p12, %s1661_s30), 7 }
  0x17   : > { %s1665_s17 = sshll.u32 %s3105_s19, 3  ;;  %s1663_s8 = sshll.u32 %s3107_s30, 2 }
  0x18   : > { %499 = vperm.xlu1 %1992, %v461_v6   ;;  %s2215_s23 = scalar_lea.vmem %s3073_s2, %s1665_s17  ;;  %s342_s12 = scalar_lea.vmem %s3072_s1, %s1663_s8 }
  0x19   : > { %1998 = vset.pattern.permute.xlu0 %v2081_v3  ;;  %v976_v12 = vld [vmem:[%s2215_s23 + $0x80] sm:$0xff]  ;;  %v977_v19 = vld [vmem:[%s2215_s23 + $0x88] sm:$0xff]  ;;  %v978_v20 = vld [vmem:[%s2215_s23 + $0x90] sm:$0xff]  ;;  %s334_s22 = scalar_lea.vmem %s3071_s0, %s3107_s30  ;;  %s1795_s8 = sshll.u32 %s2070_s27, 7 }
  0x1a   : > { %474 = vperm.xlu0 %1998, %v456_v7   ;;  %v1008_v14 = vld [vmem:[%s2215_s23 + $0x180] sm:$0xff]  ;;  %v1009_v21 = vld [vmem:[%s2215_s23 + $0x188] sm:$0xff]  ;;  %v1010_v22 = vld [vmem:[%s2215_s23 + $0x190] sm:$0xff]  ;;  %v2324_v7 = vsub.s32 2, %v2293_v59  ;;  %s3024_s16 = scalar_lea.hbm %s3078_s7, %s1795_s8  ;;  %s2084_s27 = smov [#allocation2]  }
  0x1b   : > { %v960_v16 = vld [vmem:[%s2215_s23] sm:$0xff]  ;;  %v961_v23 = vld [vmem:[%s2215_s23 + $0x8] sm:$0xff]  ;;  %v979_v26 = vld [vmem:[%s2215_s23 + $0x98] sm:$0xff]  ;;  %s2004_s20 = sshll.u32 %s2084_s27, 4  ;;  %s2005_s20 = int_to_ptr.vmem [resolvable:$false] %s2004_s20 }
  0x1c   : > { %509 = vperm.xlu1 %1992, %v463_v8   ;;  %v992_v18 = vld [vmem:[%s2215_s23 + $0x100] sm:$0xff]  ;;  %v993_v25 = vld [vmem:[%s2215_s23 + $0x108] sm:$0xff]  ;;  %v1011_v27 = vld [vmem:[%s2215_s23 + $0x198] sm:$0xff]  ;;  %s2006_s21 = scalar_lea.vmem %s2005_s20, 256 }
  0x1d   : > { %v962_v28 = vld [vmem:[%s2215_s23 + $0x10] sm:$0xff]  ;;  %v963_v29 = vld [vmem:[%s2215_s23 + $0x18] sm:$0xff]  ;;  %v981_v32 = vld [vmem:[%s2215_s23 + $0xa8] sm:$0xff] }
  0x1e   : > { %479 = vperm.xlu0 %1998, %v457_v9   ;;  %v994_v30 = vld [vmem:[%s2215_s23 + $0x110] sm:$0xff]  ;;  %v995_v31 = vld [vmem:[%s2215_s23 + $0x118] sm:$0xff]  ;;  %v964_v33 = vld [vmem:[%s2215_s23 + $0x20] sm:$0xff] }
  0x1f   : > { %v996_v35 = vld [vmem:[%s2215_s23 + $0x120] sm:$0xff]  ;;  %v1013_v40 = vld [vmem:[%s2215_s23 + $0x1a8] sm:$0xff]  ;;  %v982_v41 = vld [vmem:[%s2215_s23 + $0xb0] sm:$0xff] }
  0x20   : > { %519 = vperm.xlu1 %1992, %v465_v10   ;;  %v980_v36 = vld [vmem:[%s2215_s23 + $0xa0] sm:$0xff]  ;;  %v965_v42 = vld [vmem:[%s2215_s23 + $0x28] sm:$0xff]  ;;  %v1014_v43 = vld [vmem:[%s2215_s23 + $0x1b0] sm:$0xff] }
  0x21   : > { %v1012_v38 = vld [vmem:[%s2215_s23 + $0x1a0] sm:$0xff]  ;;  %v997_v44 = vld [vmem:[%s2215_s23 + $0x128] sm:$0xff]  ;;  %v966_v45 = vld [vmem:[%s2215_s23 + $0x30] sm:$0xff] }
  0x22   : > { %494 = vperm.xlu0 %1998, %v460_v11   ;;  %v998_v47 = vld [vmem:[%s2215_s23 + $0x130] sm:$0xff]  ;;  %v983_v50 = vld [vmem:[%s2215_s23 + $0xb8] sm:$0xff]  ;;  %v984_v53 = vld [vmem:[%s2215_s23 + $0xc0] sm:$0xff]  ;;  %v390_v11 = vsub.s32 3, %v2293_v59 }
  0x23   : > { %v1015_v52 = vld [vmem:[%s2215_s23 + $0x1b8] sm:$0xff]  ;;  %v1016_v55 = vld [vmem:[%s2215_s23 + $0x1c0] sm:$0xff]  ;;  %v2303_v62 = vld [vmem:[%s342_s12 + $0x8] sm:$0x77] }
  0x24   : > { %1075 = vperm.xlu1 %1992, %v976_v12   ;;  %v967_v54 = vld [vmem:[%s2215_s23 + $0x38] sm:$0xff]  ;;  %v968_v58 = vld [vmem:[%s2215_s23 + $0x40] sm:$0xff]  ;;  %v986_v4 = vld [vmem:[%s2215_s23 + $0xd0] sm:$0xff] }
  0x25   : > { %v999_v57 = vld [vmem:[%s2215_s23 + $0x138] sm:$0xff]  ;;  %v2301_v61 = vld [vmem:[%s342_s12] sm:$0x77]  ;;  %v985_v8 = vld [vmem:[%s2215_s23 + $0xc8] sm:$0xff] }
  0x26   : > { %504 = vperm.xlu0 %1998, %v462_v13   ;;  %v1000_v63 = vld [vmem:[%s2215_s23 + $0x140] sm:$0xff] }
  0x27   : > { %v358_v6 = vld [vmem:[%s334_s22] sm:$0xf] }
  0x28   : > { %1171 = vperm.xlu1 %1992, %v1008_v14   ;;  %v1018_v14 = vld [vmem:[%s2215_s23 + $0x1d0] sm:$0xff] }
  0x2a   : > { %514 = vperm.xlu0 %1998, %v464_v15   ;;  %v2340_v15 = vadd.s32 16, %v2293_v59 }
  0x2c   : > { %1027 = vperm.xlu1 %1992, %v960_v16  }
  0x2e   : > { %524 = vperm.xlu0 %1998, %v466_v17  }
  0x30   : > { %1123 = vperm.xlu1 %1992, %v992_v18   ;;  %v2349_v18 = vrot.slane %v358_v6, %v2324_v7 }
  0x32   : > { %1078 = vperm.xlu0 %1998, %v977_v19   ;;  %vm402_vm2 = vcmp.eq.s32.totalorder %v2340_v15, %v2349_v18  ;;  %vm394_vm10 = vcmp.eq.s32.totalorder %v2293_v59, %v2349_v18 }
  0x34   : > { %1081 = vperm.xlu1 %1992, %v978_v20  }
  0x36   : > { %1174 = vperm.xlu0 %1998, %v1009_v21   ;;  %v1017_v21 = vld [vmem:[%s2215_s23 + $0x1c8] sm:$0xff] }
  0x38   : > { %1177 = vperm.xlu1 %1992, %v1010_v22   ;;  %v2360_v22 = vrot.slane %v358_v6, %v390_v11 }
  0x3a   : > { %1030 = vperm.xlu0 %1998, %v961_v23   ;;  %v2363_v23 = vadd.s32 24, %v2293_v59  ;;  %vm403_vm3 = vcmp.eq.s32.totalorder %v2340_v15, %v2360_v22  ;;  %vm395_vm11 = vcmp.eq.s32.totalorder %v2293_v59, %v2360_v22 }
  0x3c   : > { %706 = vperm.xlu1 %1992, %v702_v24  }
  0x3e   : > { %1126 = vperm.xlu0 %1998, %v993_v25   ;;  %v970_v25 = vld [vmem:[%s2215_s23 + $0x50] sm:$0xff] }
  0x40   : > { %1993 = vset.pattern.permute.xlu1 %v2080_v2 }
  0x41   : > { %761 = vperm.xlu1 %1993, %v702_v24  }
  0x42   : > { %1084 = vperm.xlu0 %1998, %v979_v26   ;;  %v2369_v26 = vadd.s32 40, %v2293_v59 }
  0x45   : > { %1995 = vset.pattern.permute.xlu1 %v2081_v3 }
  0x46   : > { %1180 = vperm.xlu0 %1998, %v1011_v27   ;;  %1033 = vperm.xlu1 %1995, %v962_v28   ;;  %v2374_v28 = vadd.s32 56, %v2293_v59 }
  0x4a   : > { %711 = vperm.xlu0 %1998, %v2183_v0   ;;  %1036 = vperm.xlu1 %1995, %v963_v29   ;;  %v2307_v0 = vsub.s32 1, %v2293_v59  ;;  %v2377_v29 = vadd.s32 8, %v2293_v59 }
  0x4c   : > { %v771_v2 = vrot.slane %v2301_v61, %v2307_v0  ;;  %v2346_v17 = vrot.slane %v358_v6, %v2307_v0  ;;  %vm398_vm5 = vcmp.eq.s32.totalorder %v2377_v29, %v2349_v18  ;;  %vm399_vm4 = vcmp.eq.s32.totalorder %v2377_v29, %v2360_v22 }
  0x4e   : > { %1129 = vperm.xlu0 %1998, %v994_v30   ;;  %1132 = vperm.xlu1 %1995, %v995_v31   ;;  %v2328_v9 = vrot.slane %v771_v2, %v2307_v0  ;;  %v2380_v30 = vadd.s32 72, %v2293_v59  ;;  %v2383_v31 = vadd.s32 32, %v2293_v59  ;;  %vm401_vm1 = vcmp.eq.s32.totalorder %v2340_v15, %v2346_v17  ;;  %v1020_v2 = vld [vmem:[%s2215_s23 + $0x1e0] sm:$0xff] }
  0x4f   : > { %vm393_vm9 = vcmp.eq.s32.totalorder %v2293_v59, %v2346_v17  ;;  %vm397_vm13 = vcmp.eq.s32.totalorder %v2377_v29, %v2346_v17 }
  0x52   : > { %1090 = vperm.xlu0 %1998, %v981_v32   ;;  %1996 = vset.pattern.permute.xlu1 %v2082_v5  ;;  %v2321_v5 = vsub.s32 0, %v2293_v59  ;;  %v969_v32 = vld [vmem:[%s2215_s23 + $0x48] sm:$0xff] }
  0x53   : > { %821 = vperm.xlu1 %1996, %v702_v24  }
  0x54   : > { %v2343_v16 = vrot.slane %v358_v6, %v2321_v5 }
  0x56   : > { %1039 = vperm.xlu0 %1998, %v964_v33   ;;  %vm400_vm0 = vcmp.eq.s32.totalorder %v2340_v15, %v2343_v16  ;;  %v2392_v33 = vand.u32 127, %v359_v56  ;;  %vm392_vm8 = vcmp.eq.s32.totalorder %v2293_v59, %v2343_v16  ;;  %vm396_vm12 = vcmp.eq.s32.totalorder %v2377_v29, %v2343_v16 }
  0x57   : > { %1999 = vset.pattern.permute.xlu1 %v2081_v3  ;;  %v779_v3 = vrot.slane %v2303_v62, %v2307_v0 }
  0x58   : > { %529 = vperm.xlu1 %1999, %v467_v34  }
  0x59   : > { %v2331_v10 = vrot.slane %v779_v3, %v2307_v0 }
  0x5a   : > { %1135 = vperm.xlu0 %1998, %v996_v35   ;;  %v1002_v35 = vld [vmem:[%s2215_s23 + $0x150] sm:$0xff] }
  0x5c   : > { %1087 = vperm.xlu1 %1999, %v980_v36   ;;  %v2412_v36 = vadd.s32 48, %v2293_v59 }
  0x5e   : > { %534 = vperm.xlu0 %1998, %v468_v37   ;;  %vm416_vm14 = vcmp.eq.s32.totalorder %v2412_v36, %v2343_v16  ;;  %vm417_vm15 = vcmp.eq.s32.totalorder %v2412_v36, %v2346_v17  ;;  %vm418_vm7 = vcmp.eq.s32.totalorder %v2412_v36, %v2349_v18  ;;  %vm419_vm6 = vcmp.eq.s32.totalorder %v2412_v36, %v2360_v22 }
  0x60   : > { %1183 = vperm.xlu1 %1999, %v1012_v38   ;;  %v1001_v38 = vld [vmem:[%s2215_s23 + $0x148] sm:$0xff] }
  0x62   : > { %889 = vperm.xlu0 %1998, %v881_v39   ;;  %v2444_v39 = vadd.s32 64, %v2293_v59 }
  0x64   : > { %1186 = vperm.xlu1 %1999, %v1013_v40   ;;  %v2447_v40 = vadd.s32 80, %v2293_v59 }
  0x66   : > { %1093 = vperm.xlu0 %1998, %v982_v41  }
  0x68   : > { %1042 = vperm.xlu1 %1999, %v965_v42   ;;  %v988_v42 = vld [vmem:[%s2215_s23 + $0xe0] sm:$0xff] }
  0x6a   : > { %1189 = vperm.xlu0 %1998, %v1014_v43  }
  0x6c   : > { %1138 = vperm.xlu1 %1999, %v997_v44  }
  0x6e   : > { %1045 = vperm.xlu0 %1998, %v966_v45  }
  0x70   : > { %884 = vperm.xlu1 %1999, %v880_v46  }
  0x72   : > { %1141 = vperm.xlu0 %1998, %v998_v47  }
  0x74   : > { %539 = vperm.xlu1 %1999, %v469_v48  }
  0x76   : > { %544 = vperm.xlu0 %1998, %v470_v49  }
  0x78   : > { %1096 = vperm.xlu1 %1999, %v983_v50  }
  0x7a   : > { %917 = vperm.xlu0 %1998, %v909_v51  }
  0x7c   : > { %1192 = vperm.xlu1 %1999, %v1015_v52   ;;  %v987_v52 = vld [vmem:[%s2215_s23 + $0xd8] sm:$0xff] }
  0x7e   : > { %1099 = vperm.xlu0 %1998, %v984_v53  }
  0x80   : > { %1048 = vperm.xlu1 %1999, %v967_v54  }
  0x82   : > { %1195 = vperm.xlu0 %1998, %v1016_v55  }
  0x84   : > { %1144 = vperm.xlu1 %1999, %v999_v57  }
  0x86   : > { %1051 = vperm.xlu0 %1998, %v968_v58  }
  0x88   : > { %912 = vperm.xlu1 %1999, %v908_v60  }
  0x8a   : > { %1147 = vperm.xlu0 %1998, %v1000_v63  }
  0x8c   : > { %549 = vperm.xlu1 %1999, %v471_v1  }
  0x8e   : > { %1105 = vperm.xlu0 %1998, %v986_v4  }
  0x8f   : > { %v2334_v12 = vpop.permute.xlu1 %484  ;;  %v2336_v13 = vpop.permute.xlu0 %765 }
  0x90   : > { %1102 = vperm.xlu1 %1999, %v985_v8   ;;  %v2353_v19 = vmul.f32 %v2328_v9, %v2336_v13  ;;  %v2357_v20 = vmul.f32 %v2331_v10, %v2336_v13  ;;  %v560_v47 = vsel %vm400_vm0, %v2334_v12, 0.0  ;;  %v561_v48 = vsel %vm401_vm1, %v2334_v12, 0.0 }
  0x91   : > { %v562_v49 = vsel %vm402_vm2, %v2334_v12, 0.0  ;;  %v563_v50 = vsel %vm403_vm3, %v2334_v12, 0.0  ;;  %vm421_vm0 = vcmp.eq.s32.totalorder %v2374_v28, %v2346_v17  ;;  %vm422_vm1 = vcmp.eq.s32.totalorder %v2374_v28, %v2349_v18 }
  0x92   : > { %1201 = vperm.xlu0 %1998, %v1018_v14   ;;  %vm424_vm2 = vcmp.eq.s32.totalorder %v2444_v39, %v2343_v16  ;;  %vm425_vm3 = vcmp.eq.s32.totalorder %v2444_v39, %v2346_v17 }
  0x93   : > { %v2365_v24 = vpop.permute.xlu1 %489 }
  0x94   : > { %1198 = vperm.xlu1 %1999, %v1017_v21   ;;  %v2371_v27 = vpop.permute.xlu0 %825 }
  0x96   : > { %1057 = vperm.xlu0 %1998, %v970_v25   ;;  %v1019_v25 = vld [vmem:[%s2215_s23 + $0x1d8] sm:$0xff] }
  0x97   : > { %v2404_v34 = vpop.permute.xlu1 %499 }
  0x98   : > { %1054 = vperm.xlu1 %1999, %v969_v32  }
  0x99   : > { %v475_v37 = vpop.permute.xlu0 %474 }
  0x9a   : > { %1153 = vperm.xlu0 %1998, %v1002_v35   ;;  %v552_v43 = vsel %vm392_vm8, %v475_v37, 0.0  ;;  %v553_v44 = vsel %vm393_vm9, %v475_v37, 0.0  ;;  %v554_v45 = vsel %vm394_vm10, %v475_v37, 0.0  ;;  %v555_v46 = vsel %vm395_vm11, %v475_v37, 0.0 }
  0x9b   : > { %v2449_v41 = vpop.permute.xlu1 %509  ;;  %vm420_vm8 = vcmp.eq.s32.totalorder %v2374_v28, %v2343_v16  ;;  %vm423_vm9 = vcmp.eq.s32.totalorder %v2374_v28, %v2360_v22  ;;  %vm3081_vm10 = vcmp.eq.s32.totalorder %v2363_v23, %v2343_v16  ;;  %vm3082_vm11 = vcmp.eq.s32.totalorder %v2363_v23, %v2346_v17 }
  0x9c   : > { %1150 = vperm.xlu1 %1999, %v1001_v38   ;;  %v564_v3 = vsel %vm3081_vm10, %v2365_v24, 0.0  ;;  %v565_v4 = vsel %vm3082_vm11, %v2365_v24, 0.0  ;;  %vm3085_vm10 = vcmp.eq.s32.totalorder %v2383_v31, %v2343_v16  ;;  %vm3086_vm11 = vcmp.eq.s32.totalorder %v2383_v31, %v2346_v17 }
  0x9d   : > { %v480_v51 = vpop.permute.xlu0 %479  ;;  %v581_v36 = vsel %vm421_vm0, %v2449_v41, 0.0  ;;  %vm3095_vm0 = vcmp.eq.s32.totalorder %v2380_v30, %v2349_v18 }
  0x9e   : > { %v556_v53 = vsel %vm396_vm12, %v480_v51, 0.0  ;;  %v557_v54 = vsel %vm397_vm13, %v480_v51, 0.0  ;;  %v558_v55 = vsel %vm398_vm5, %v480_v51, 0.0  ;;  %v559_v56 = vsel %vm399_vm4, %v480_v51, 0.0  ;;  %1111 = vperm.xlu0 %1998, %v988_v42  }
  0x9f   : > { %v616_v57 = vadd.f32 %v556_v53, %v552_v43  ;;  %v637_v58 = vadd.f32 %v557_v54, %v553_v44  ;;  %v658_v60 = vadd.f32 %v558_v55, %v554_v45  ;;  %v679_v63 = vadd.f32 %v559_v56, %v555_v46  ;;  %v2509_v1 = vpop.permute.xlu1 %519  ;;  %v972_v43 = vld [vmem:[%s2215_s23 + $0x60] sm:$0xff]  ;;  %v971_v53 = vld [vmem:[%s2215_s23 + $0x58] sm:$0xff] }
  0xa0   : > { %vm3083_vm12 = vcmp.eq.s32.totalorder %v2363_v23, %v2349_v18  ;;  %vm3084_vm13 = vcmp.eq.s32.totalorder %v2363_v23, %v2360_v22  ;;  %1108 = vperm.xlu1 %1999, %v987_v52   ;;  %vm428_vm4 = vcmp.eq.s32.totalorder %v2380_v30, %v2343_v16  ;;  %vm429_vm5 = vcmp.eq.s32.totalorder %v2380_v30, %v2346_v17 }
  0xa1   : > { %v566_v6 = vsel %vm3083_vm12, %v2365_v24, 0.0  ;;  %v567_v8 = vsel %vm3084_vm13, %v2365_v24, 0.0  ;;  %v617_v11 = vadd.f32 %v616_v57, %v560_v47  ;;  %v638_v12 = vadd.f32 %v637_v58, %v561_v48  ;;  %v495_v21 = vpop.permute.xlu0 %494 }
  0xa2   : > { %v659_v14 = vadd.f32 %v658_v60, %v562_v49  ;;  %v680_v15 = vadd.f32 %v679_v63, %v563_v50  ;;  %v568_v29 = vsel %vm3085_vm10, %v495_v21, 0.0  ;;  %v569_v32 = vsel %vm3086_vm11, %v495_v21, 0.0  ;;  %1207 = vperm.xlu0 %1998, %v1020_v2   ;;  %v1004_v2 = vld [vmem:[%s2215_s23 + $0x160] sm:$0xff] }
  0xa3   : > { %vm3087_vm12 = vcmp.eq.s32.totalorder %v2383_v31, %v2349_v18  ;;  %vm3088_vm13 = vcmp.eq.s32.totalorder %v2383_v31, %v2360_v22  ;;  %v618_v35 = vadd.f32 %v617_v11, %v564_v3  ;;  %v639_v37 = vadd.f32 %v638_v12, %v565_v4  ;;  %v2557_v31 = vpop.permute.xlu1 %1075 }
  0xa4   : > { %v570_v23 = vsel %vm3087_vm12, %v495_v21, 0.0  ;;  %v571_v24 = vsel %vm3088_vm13, %v495_v21, 0.0  ;;  %v660_v38 = vadd.f32 %v659_v14, %v566_v6  ;;  %v681_v42 = vadd.f32 %v680_v15, %v567_v8  ;;  %1204 = vperm.xlu1 %1999, %v1019_v25   ;;  %v1003_v21 = vld [vmem:[%s2215_s23 + $0x158] sm:$0xff] }
  0xa5   : > { %vm3089_vm12 = vcmp.eq.s32.totalorder %v2369_v26, %v2343_v16  ;;  %vm3090_vm13 = vcmp.eq.s32.totalorder %v2369_v26, %v2346_v17  ;;  %vm3091_vm11 = vcmp.eq.s32.totalorder %v2369_v26, %v2349_v18  ;;  %vm3092_vm10 = vcmp.eq.s32.totalorder %v2369_v26, %v2360_v22  ;;  %v505_v52 = vpop.permute.xlu0 %504 }
  0xa6   : > { %v572_v44 = vsel %vm3089_vm12, %v2404_v34, 0.0  ;;  %v573_v45 = vsel %vm3090_vm13, %v2404_v34, 0.0  ;;  %v574_v46 = vsel %vm3091_vm11, %v2404_v34, 0.0  ;;  %v575_v47 = vsel %vm3092_vm10, %v2404_v34, 0.0  ;;  %1063 = vperm.xlu0 %1998, %v972_v43  }
  0xa7   : > { %v619_v48 = vadd.f32 %v618_v35, %v568_v29  ;;  %v640_v49 = vadd.f32 %v639_v37, %v569_v32  ;;  %v661_v50 = vadd.f32 %v660_v38, %v570_v23  ;;  %v682_v51 = vadd.f32 %v681_v42, %v571_v24  ;;  %v2591_v63 = vpop.permute.xlu1 %1171  ;;  %v990_v38 = vld [vmem:[%s2215_s23 + $0xf0] sm:$0xff] }
  0xa8   : > { %vm432_vm12 = vcmp.eq.s32.totalorder %v2447_v40, %v2343_v16  ;;  %v576_v54 = vsel %vm416_vm14, %v505_v52, 0.0  ;;  %v577_v26 = vsel %vm417_vm15, %v505_v52, 0.0  ;;  %v578_v34 = vsel %vm418_vm7, %v505_v52, 0.0  ;;  %1060 = vperm.xlu1 %1999, %v971_v53  }
  0xa9   : > { %v579_v55 = vsel %vm419_vm6, %v505_v52, 0.0  ;;  %v620_v56 = vadd.f32 %v619_v48, %v572_v44  ;;  %v641_v57 = vadd.f32 %v640_v49, %v573_v45  ;;  %v662_v58 = vadd.f32 %v661_v50, %v574_v46  ;;  %v515_v15 = vpop.permute.xlu0 %514  ;;  %v989_v46 = vld [vmem:[%s2215_s23 + $0xe8] sm:$0xff] }
  0xaa   : > { %v683_v60 = vadd.f32 %v682_v51, %v575_v47  ;;  %v580_v3 = vsel %vm420_vm8, %v2449_v41, 0.0  ;;  %v582_v4 = vsel %vm422_vm1, %v2449_v41, 0.0  ;;  %v583_v6 = vsel %vm423_vm9, %v2449_v41, 0.0  ;;  %1159 = vperm.xlu0 %1998, %v1004_v2  }
  0xab   : > { %v621_v8 = vadd.f32 %v620_v56, %v576_v54  ;;  %v642_v11 = vadd.f32 %v641_v57, %v577_v26  ;;  %v663_v12 = vadd.f32 %v662_v58, %v578_v34  ;;  %v584_v25 = vsel %vm424_vm2, %v515_v15, 0.0  ;;  %v2623_v37 = vpop.permute.xlu1 %1027  ;;  %v1022_v34 = vld [vmem:[%s2215_s23 + $0x1f0] sm:$0xff] }
  0xac   : > { %v684_v14 = vadd.f32 %v683_v60, %v579_v55  ;;  %v585_v29 = vsel %vm425_vm3, %v515_v15, 0.0  ;;  %vm3093_vm6 = vcmp.eq.s32.totalorder %v2444_v39, %v2349_v18  ;;  %vm3094_vm7 = vcmp.eq.s32.totalorder %v2444_v39, %v2360_v22  ;;  %1156 = vperm.xlu1 %1999, %v1003_v21  }
  0xad   : > { %v586_v28 = vsel %vm3093_vm6, %v515_v15, 0.0  ;;  %v587_v41 = vsel %vm3094_vm7, %v515_v15, 0.0  ;;  %v622_v32 = vadd.f32 %v621_v8, %v580_v3  ;;  %v643_v23 = vadd.f32 %v642_v11, %v581_v36  ;;  %v525_v45 = vpop.permute.xlu0 %524  ;;  %v1021_v36 = vld [vmem:[%s2215_s23 + $0x1e8] sm:$0xff]  ;;  %v1006_v15 = vld [vmem:[%s2215_s23 + $0x170] sm:$0xff] }
  0xae   : > { %v664_v24 = vadd.f32 %v663_v12, %v582_v4  ;;  %v685_v35 = vadd.f32 %v684_v14, %v583_v6  ;;  %vm433_vm14 = vcmp.eq.s32.totalorder %v2447_v40, %v2346_v17  ;;  %vm434_vm15 = vcmp.eq.s32.totalorder %v2447_v40, %v2349_v18  ;;  %1117 = vperm.xlu0 %1998, %v990_v38   ;;  %v974_v4 = vld [vmem:[%s2215_s23 + $0x70] sm:$0xff]  ;;  %v973_v11 = vld [vmem:[%s2215_s23 + $0x68] sm:$0xff] }
  0xaf   : > { %vm435_vm8 = vcmp.eq.s32.totalorder %v2447_v40, %v2360_v22  ;;  %v623_v39 = vadd.f32 %v622_v32, %v584_v25  ;;  %v644_v42 = vadd.f32 %v643_v23, %v585_v29  ;;  %v588_v47 = vsel %vm428_vm4, %v2509_v1, 0.0  ;;  %v1124_v26 = vpop.permute.xlu1 %1123 }
  0xb0   : > { %v665_v43 = vadd.f32 %v664_v24, %v586_v28  ;;  %v686_v44 = vadd.f32 %v685_v35, %v587_v41  ;;  %v589_v48 = vsel %vm429_vm5, %v2509_v1, 0.0  ;;  %v590_v49 = vsel %vm3095_vm0, %v2509_v1, 0.0  ;;  %1114 = vperm.xlu1 %1999, %v989_v46   ;;  %v1005_v28 = vld [vmem:[%s2215_s23 + $0x168] sm:$0xff] }
  0xb1   : > { %vm3096_vm1 = vcmp.eq.s32.totalorder %v2380_v30, %v2360_v22  ;;  %v624_v51 = vadd.f32 %v623_v39, %v588_v47  ;;  %v645_v52 = vadd.f32 %v644_v42, %v589_v48  ;;  %v592_v55 = vsel %vm432_vm12, %v525_v45, 0.0  ;;  %v1079_v3 = vpop.permute.xlu0 %1078  ;;  %v991_v39 = vld [vmem:[%s2215_s23 + $0xf8] sm:$0xff] }
  0xb2   : > { %v591_v50 = vsel %vm3096_vm1, %v2509_v1, 0.0  ;;  %v666_v53 = vadd.f32 %v665_v43, %v590_v49  ;;  %v593_v56 = vsel %vm433_vm14, %v525_v45, 0.0  ;;  %v594_v30 = vsel %vm434_vm15, %v525_v45, 0.0  ;;  %1213 = vperm.xlu0 %1998, %v1022_v34  }
  0xb3   : > { %v687_v54 = vadd.f32 %v686_v44, %v591_v50  ;;  %v595_v1 = vsel %vm435_vm8, %v525_v45, 0.0  ;;  %v2662_v57 = vadd.f32 %v624_v51, %v592_v55  ;;  %v2664_v58 = vadd.f32 %v645_v52, %v593_v56  ;;  %v1082_v40 = vpop.permute.xlu1 %1081  ;;  %v1023_v52 = vld [vmem:[%s2215_s23 + $0x1f8] sm:$0xff] }
  0xb4   : > { %v2666_v60 = vadd.f32 %v666_v53, %v594_v30  ;;  %vm1234_vm9 = vcmp.eq.s32.totalorder %v2557_v31, %v2392_v33  ;;  %vm1235_vm2 = vcmp.eq.s32.totalorder %v1079_v3, %v2392_v33  ;;  %v2083_v6 = vmov 1.0|1.0   ;;  %1210 = vperm.xlu1 %1999, %v1021_v36   ;;  %v975_v36 = vld [vmem:[%s2215_s23 + $0x78] sm:$0xff] }
  0xb5   : > { %v2668_v2 = vadd.f32 %v687_v54, %v595_v1  ;;  %vm1868_vm3 = vmpackc.low %vm1235_vm2, %vm1234_vm9  ;;  %v1175_v8 = vpop.permute.xlu0 %1174  ;;  %v722_v12 = vsub.s32 4, %v2293_v59  ;;  %vm1266_vm5 = vcmp.eq.s32.totalorder %v2591_v63, %v2392_v33  ;;  %v774_v31 = vsub.s32 5, %v2293_v59 }
  0xb6   : > { %1869 = vmatprep.subr.msk.bf16.mxu0 %vm1868_vm3, %v2083_v6  ;;  %vm1267_vm4 = vcmp.eq.s32.totalorder %v1175_v8, %v2392_v33  ;;  %1069 = vperm.xlu0 %1998, %v974_v4   ;;  %v719_v21 = vrot.slane %v2301_v61, %v2321_v5  ;;  %v727_v25 = vrot.slane %v2303_v62, %v2321_v5  ;;  %v834_v42 = vsub.s32 6, %v2293_v59 }
  0xb7   : > { %v1178_v14 = vpop.permute.xlu1 %1177  ;;  %vm1900_vm10 = vmpackc.low %vm1267_vm4, %vm1266_vm5  ;;  %v731_v63 = vrot.slane %v2303_v62, %v722_v12  ;;  %vm1218_vm11 = vcmp.eq.s32.totalorder %v2623_v37, %v2392_v33  ;;  %v783_v41 = vrot.slane %v2303_v62, %v774_v31  ;;  %vm1250_vm6 = vcmp.eq.s32.totalorder %v1124_v26, %v2392_v33 }
  0xb8   : > { %1901 = vmatprep.subr.msk.bf16.mxu1 %vm1900_vm10, %v2083_v6  ;;  %1066 = vperm.xlu1 %1999, %v973_v11   ;;  %v739_v23 = vrot.slane %v719_v21, %v2321_v5  ;;  %v747_v24 = vrot.slane %v727_v25, %v2321_v5  ;;  %v775_v43 = vrot.slane %v2301_v61, %v774_v31 }
  0xb9   : > { %v1031_v29 = vpop.permute.xlu0 %1030  ;;  %v751_v35 = vrot.slane %v731_v63, %v2321_v5  ;;  %v803_v37 = vrot.slane %v783_v41, %v2307_v0  ;;  %v831_v53 = vrot.slane %v2301_v61, %v2324_v7  ;;  %vm1236_vm15 = vcmp.eq.s32.totalorder %v1082_v40, %v2392_v33 }
  0xba   : > { %vm1219_vm13 = vcmp.eq.s32.totalorder %v1031_v29, %v2392_v33  ;;  %1165 = vperm.xlu0 %1998, %v1006_v15   ;;  %v835_v54 = vrot.slane %v2301_v61, %v834_v42  ;;  %v2732_v55 = vrot.slane %v775_v43, %v2307_v0  ;;  %v839_v56 = vrot.slane %v2303_v62, %v2324_v7 }
  0xbb   : > { %vm1870_vm12 = vmpackc.low %vm1219_vm13, %vm1218_vm11  ;;  %v2694_v32 = vpop.permute.xlu1 %706  ;;  %v843_v30 = vrot.slane %v2303_v62, %v834_v42  ;;  %vm1268_vm1 = vcmp.eq.s32.totalorder %v1178_v14, %v2392_v33  ;;  %v811_v4 = vmul.f32 %v803_v37, %v2336_v13  ;;  %v1007_v14 = vld [vmem:[%s2215_s23 + $0x178] sm:$0xff]  ;;  %s327_s23 = sand.u32 1, %s2062_s25  }
  0xbc   : > { %1162 = vperm.xlu1 %1999, %v1005_v28   ;;  %1871 = vmatpush3.bf16.msk.msra.mxu0 %vm1870_vm12, %v2083_v6  ;;  %v752_v44 = vmul.f32 %v739_v23, %v2694_v32  ;;  %v754_v45 = vmul.f32 %v747_v24, %v2694_v32  ;;  %v755_v47 = vmul.f32 %v751_v35, %v2694_v32  ;;  %s1660_s30 = sshll.u32 %s327_s23, 3  ;;  %s1554_s17 = scalar_lea.sflag [#allocation3], %s327_s23 }
  0xbd   : > { %v1127_v38 = vpop.permute.xlu0 %1126  ;;  %v2742_v40 = vrot.slane %v835_v54, %v2324_v7  ;;  %v809_v62 = vmul.f32 %v2732_v55, %v2336_v13  ;;  %v859_v8 = vrot.slane %v839_v56, %v2324_v7  ;;  %v2753_v11 = vrot.slane %v843_v30, %v2324_v7  ;;  %s329_s19 = scalar_lea.vmem [#allocation2], %s1660_s30 }
  0xbe   : > { %vm1251_vm7 = vcmp.eq.s32.totalorder %v1127_v38, %v2392_v33  ;;  %s1567_s10 = sshll.u32 %s329_s19, 4  ;;  %s3026_s10 = int_to_ptr.vmem [resolvable:$true] %s1567_s10 }
  0xbf   : > { %vm1902_vm14 = vmpackc.low %vm1251_vm7, %vm1250_vm6  ;;  %v869_v63 = vmul.f32 %v2742_v40, %v2371_v27  ;;  %s2000_s18 = scalar_lea.vmem %s3026_s10, 128  ;;  %p2007_p2 = scmp.lt.s32.totalorder %s3026_s10, %s2005_s20 }
  0xc0   : > { %1120 = vperm.xlu1 %1999, %v991_v39   ;;  %1903 = vmatpush3.bf16.msk.msra.mxu1 %vm1902_vm14, %v2083_v6  ;;  %v2709_v46 = vpop.permute.xlu1 %761  ;;  %p2001_p13 = scmp.ne.s32.totalorder %s3026_s10, %s2000_s18  ;;  %p2008_p3 = scmp.lt.s32.totalorder %s2006_s21, %s2000_s18 }
  0xc1   : > { %v804_v48 = vmul.f32 %v2328_v9, %v2709_v46  ;;  %v806_v49 = vmul.f32 %v2331_v10, %v2709_v46  ;;  %v807_v50 = vmul.f32 %v803_v37, %v2709_v46  ;;  %v1085_v51 = vpop.permute.xlu0 %1084  ;;  %v723_v10 = vrot.slane %v2301_v61, %v722_v12 }
  0xc2   : > { %vm1237_vm8 = vcmp.eq.s32.totalorder %v1085_v51, %v2392_v33  ;;  %v851_v61 = vrot.slane %v831_v53, %v2324_v7  ;;  %v2791_v51 = vadd.s32 96, %v2293_v59  ;;  %p2002_p0 = pnand %p2001_p13, %p2165_p4  ;;  %p2009_p5 = por %p2008_p3, %p2007_p2 }
  0xc3   : > { %v2723_v26 = vadd.f32 %v804_v48, %v752_v44  ;;  %v2725_v9 = vadd.f32 %v806_v49, %v754_v45  ;;  %v2727_v34 = vadd.f32 %v807_v50, %v755_v47  ;;  %vm1872_vm0 = vmpackc.low %vm1237_vm8, %vm1236_vm15  ;;  %v2745_v0 = vrot.slane %v723_v10, %v2321_v5 }
  0xc4   : > { %1216 = vperm.xlu1 %1999, %v1023_v52   ;;  %1873 = vmatprep.subr.msk.bf16.mxu0 %vm1872_vm0, %v2083_v6  ;;  %v868_v29 = vmul.f32 %v851_v61, %v2371_v27  ;;  %vm440_vm7 = vcmp.eq.s32.totalorder %v2791_v51, %v2343_v16  ;;  %vm442_vm14 = vcmp.eq.s32.totalorder %v2791_v51, %v2349_v18  ;;  %p2003_p1 = pneg %p2002_p0 }
  0xc5   : > { %v1181_v1 = vpop.permute.xlu0 %1180  ;;  %v1034_v3 = vpop.permute.xlu1 %1033 }
  0xc6   : > { %vm1269_vm9 = vcmp.eq.s32.totalorder %v1181_v1, %v2392_v33  ;;  %vm1220_vm3 = vcmp.eq.s32.totalorder %v1034_v3, %v2392_v33  ;;  %p2010_p6 = pnand %p2009_p5, %p2003_p1 }
  0xc7   : > { %vm1904_vm2 = vmpackc.low %vm1269_vm9, %vm1268_vm1 }
  0xc8   : > { %1072 = vperm.xlu1 %1999, %v975_v36   ;;  %1905 = vmatprep.subr.msk.bf16.mxu1 %vm1904_vm2, %v2083_v6 }
  0xc9   : > { %v712_v12 = vpop.permute.xlu0 %711  ;;  %v1037_v31 = vpop.permute.xlu1 %1036 }
  0xca   : > { %v756_v15 = vmul.f32 %v739_v23, %v712_v12  ;;  %v757_v5 = vmul.f32 %v2745_v0, %v712_v12  ;;  %v758_v21 = vmul.f32 %v747_v24, %v712_v12  ;;  %v759_v25 = vmul.f32 %v751_v35, %v712_v12 }
  0xcb   : > { %vm1221_vm5 = vcmp.eq.s32.totalorder %v1037_v31, %v2392_v33  ;;  %v870_v23 = vmul.f32 %v859_v8, %v2371_v27  ;;  %v871_v24 = vmul.f32 %v2753_v11, %v2371_v27  ;;  %v2776_v27 = vadd.s32 88, %v2293_v59 }
  0xcc   : > { %v816_v7 = vadd.f32 %v2353_v19, %v756_v15  ;;  %v817_v13 = vadd.f32 %v809_v62, %v757_v5  ;;  %v818_v28 = vadd.f32 %v2357_v20, %v758_v21  ;;  %v819_v41 = vadd.f32 %v811_v4, %v759_v25  ;;  %vm1874_vm4 = vmpackc.low %vm1221_vm5, %vm1220_vm3  ;;  %1168 = vperm.xlu1 %1999, %v1007_v14  }
  0xcd   : > { %1875 = vmatpush3.bf16.msk.msra.mxu0 %vm1874_vm4, %v2083_v6  ;;  %v1130_v35 = vpop.permute.xlu0 %1129  ;;  %v1133_v38 = vpop.permute.xlu1 %1132  ;;  %vm436_vm12 = vcmp.eq.s32.totalorder %v2776_v27, %v2343_v16  ;;  %vm438_vm6 = vcmp.eq.s32.totalorder %v2776_v27, %v2349_v18  ;;  %v2825_v5 = vadd.s32 104, %v2293_v59 }
  0xce   : > { %vm1252_vm10 = vcmp.eq.s32.totalorder %v1130_v35, %v2392_v33  ;;  %vm1253_vm11 = vcmp.eq.s32.totalorder %v1133_v38, %v2392_v33  ;;  %v876_v19 = vadd.f32 %v868_v29, %v816_v7  ;;  %v2770_v39 = vadd.f32 %v869_v63, %v817_v13 }
  0xcf   : > { %vm1906_vm13 = vmpackc.low %vm1253_vm11, %vm1252_vm10  ;;  %v878_v20 = vadd.f32 %v870_v23, %v818_v28  ;;  %v2772_v37 = vadd.f32 %v871_v24, %v819_v41  ;;  %v805_v38 = vmul.f32 %v2732_v55, %v2709_v46 }
  0xd0   : > { %1907 = vmatpush3.bf16.msk.msra.mxu1 %vm1906_vm13, %v2083_v6 }
  0xd1   : > { %v1091_v42 = vpop.permute.xlu0 %1090 }
  0xd2   : > { %v2778_v43 = vpop.permute.xlu1 %821  ;;  %vm1239_vm15 = vcmp.eq.s32.totalorder %v1091_v42, %v2392_v33  ;;  %v753_v42 = vmul.f32 %v2745_v0, %v2694_v32 }
  0xd3   : > { %v864_v44 = vmul.f32 %v851_v61, %v2778_v43  ;;  %v866_v45 = vmul.f32 %v859_v8, %v2778_v43  ;;  %v867_v46 = vmul.f32 %v2753_v11, %v2778_v43 }
  0xd5   : > { %v1040_v47 = vpop.permute.xlu0 %1039  ;;  %v872_v48 = vadd.f32 %v864_v44, %v2723_v26  ;;  %v874_v49 = vadd.f32 %v866_v45, %v2725_v9  ;;  %v865_v44 = vmul.f32 %v2742_v40, %v2778_v43 }
  0xd6   : > { %vm1222_vm3 = vcmp.eq.s32.totalorder %v1040_v47, %v2392_v33  ;;  %v813_v47 = vadd.f32 %v805_v38, %v753_v42 }
  0xd7   : > { %v2788_v50 = vpop.permute.xlu1 %529 }
  0xd8   : > { %v596_v52 = vsel %vm436_vm12, %v2788_v50, 0.0  ;;  %v598_v53 = vsel %vm438_vm6, %v2788_v50, 0.0  ;;  %vm444_vm12 = vcmp.eq.s32.totalorder %v2825_v5, %v2343_v16  ;;  %vm446_vm6 = vcmp.eq.s32.totalorder %v2825_v5, %v2349_v18 }
  0xd9   : > { %v626_v54 = vadd.f32 %v2662_v57, %v596_v52  ;;  %v668_v10 = vadd.f32 %v2666_v60, %v598_v53  ;;  %v1136_v56 = vpop.permute.xlu0 %1135  ;;  %v873_v11 = vadd.f32 %v865_v44, %v813_v47 }
  0xda   : > { %vm1254_vm10 = vcmp.eq.s32.totalorder %v1136_v56, %v2392_v33 }
  0xdb   : > { %v1088_v30 = vpop.permute.xlu1 %1087 }
  0xdc   : > { %vm1238_vm8 = vcmp.eq.s32.totalorder %v1088_v30, %v2392_v33 }
  0xdd   : > { %vm1876_vm0 = vmpackc.low %vm1239_vm15, %vm1238_vm8  ;;  %v2803_v26 = vpop.permute.xlu0 %534 }
  0xde   : > { %v600_v9 = vsel %vm440_vm7, %v2803_v26, 0.0  ;;  %v602_v57 = vsel %vm442_vm14, %v2803_v26, 0.0  ;;  %1877 = vmatprep.subr.msk.bf16.mxu0 %vm1876_vm0, %v2083_v6  ;;  %vm437_vm7 = vcmp.eq.s32.totalorder %v2776_v27, %v2346_v17  ;;  %vm439_vm0 = vcmp.eq.s32.totalorder %v2776_v27, %v2360_v22 }
  0xdf   : > { %v627_v60 = vadd.f32 %v626_v54, %v600_v9  ;;  %v669_v1 = vadd.f32 %v668_v10, %v602_v57  ;;  %v1184_v3 = vpop.permute.xlu1 %1183  ;;  %v597_v55 = vsel %vm437_vm7, %v2788_v50, 0.0  ;;  %v599_v32 = vsel %vm439_vm0, %v2788_v50, 0.0 }
  0xe0   : > { %vm1270_vm1 = vcmp.eq.s32.totalorder %v1184_v3, %v2392_v33  ;;  %v647_v0 = vadd.f32 %v2664_v58, %v597_v55  ;;  %v875_v27 = vadd.f32 %v867_v46, %v2727_v34  ;;  %v689_v34 = vadd.f32 %v2668_v2, %v599_v32 }
  0xe1   : > { %v2808_v36 = vpop.permute.xlu0 %889 }
  0xe2   : > { %v2811_v61 = vadd.f32 %v2808_v36, %v876_v19  ;;  %v2814_v62 = vadd.f32 %v2808_v36, %v878_v20  ;;  %v2851_v19 = vadd.s32 112, %v2293_v59  ;;  %v899_v58 = vadd.f32 %v2808_v36, %v2772_v37 }
  0xe3   : > { %v1187_v4 = vpop.permute.xlu1 %1186  ;;  %v375_v37 = vadd.s32 120, %v2293_v59 }
  0xe4   : > { %vm1271_vm9 = vcmp.eq.s32.totalorder %v1187_v4, %v2392_v33  ;;  %vm450_vm7 = vcmp.eq.s32.totalorder %v2851_v19, %v2349_v18  ;;  %v904_v56 = vmax.f32 %v2811_v61, 0.0  ;;  %v907_v9 = vmax.f32 %v899_v58, 0.0 }
  0xe5   : > { %v1094_v8 = vpop.permute.xlu0 %1093  ;;  %vm1908_vm2 = vmpackc.low %vm1271_vm9, %vm1270_vm1  ;;  %vm441_vm1 = vcmp.eq.s32.totalorder %v2791_v51, %v2346_v17  ;;  %vm443_vm9 = vcmp.eq.s32.totalorder %v2791_v51, %v2360_v22 }
  0xe6   : > { %1909 = vmatprep.subr.msk.bf16.mxu1 %vm1908_vm2, %v2083_v6  ;;  %vm1240_vm14 = vcmp.eq.s32.totalorder %v1094_v8, %v2392_v33  ;;  %v601_v43 = vsel %vm441_vm1, %v2803_v26, 0.0 }
  0xe7   : > { %v1043_v12 = vpop.permute.xlu1 %1042  ;;  %v648_v51 = vadd.f32 %v647_v0, %v601_v43 }
  0xe8   : > { %vm1223_vm5 = vcmp.eq.s32.totalorder %v1043_v12, %v2392_v33 }
  0xe9   : > { %vm1878_vm4 = vmpackc.low %vm1223_vm5, %vm1222_vm3  ;;  %v1190_v31 = vpop.permute.xlu0 %1189  ;;  %vm445_vm5 = vcmp.eq.s32.totalorder %v2825_v5, %v2346_v17 }
  0xea   : > { %1879 = vmatpush3.bf16.msk.msra.mxu0 %vm1878_vm4, %v2083_v6  ;;  %vm1272_vm2 = vcmp.eq.s32.totalorder %v1190_v31, %v2392_v33  ;;  %vm447_vm4 = vcmp.eq.s32.totalorder %v2825_v5, %v2360_v22 }
  0xeb   : > { %v1139_v14 = vpop.permute.xlu1 %1138 }
  0xec   : > { %vm1255_vm11 = vcmp.eq.s32.totalorder %v1139_v14, %v2392_v33 }
  0xed   : > { %vm1910_vm13 = vmpackc.low %vm1255_vm11, %vm1254_vm10  ;;  %v1046_v15 = vpop.permute.xlu0 %1045  ;;  %vm448_vm10 = vcmp.eq.s32.totalorder %v2851_v19, %v2343_v16 }
  0xee   : > { %1911 = vmatpush3.bf16.msk.msra.mxu1 %vm1910_vm13, %v2083_v6  ;;  %vm449_vm13 = vcmp.eq.s32.totalorder %v2851_v19, %v2346_v17 }
  0xef   : > { %v885_v21 = vpop.permute.xlu1 %884 }
  0xf0   : > { %v2828_v25 = vadd.f32 %v885_v21, %v872_v48  ;;  %v2830_v29 = vadd.f32 %v885_v21, %v874_v49  ;;  %v603_v48 = vsel %vm443_vm9, %v2803_v26, 0.0  ;;  %v897_v49 = vadd.f32 %v2808_v36, %v2770_v39 }
  0xf1   : > { %v2832_v63 = vpop.permute.xlu0 %1141  ;;  %v893_v52 = vadd.f32 %v885_v21, %v873_v11  ;;  %v895_v53 = vadd.f32 %v885_v21, %v875_v27  ;;  %v690_v54 = vadd.f32 %v689_v34, %v603_v48  ;;  %v906_v26 = vmax.f32 %v2814_v62, 0.0 }
  0xf2   : > { %v905_v30 = vmax.f32 %v897_v49, 0.0  ;;  %v900_v59 = vmax.f32 %v2828_v25, 0.0  ;;  %vm452_vm9 = vcmp.eq.s32.totalorder %v375_v37, %v2343_v16 }
  0xf3   : > { %v540_v7 = vpop.permute.xlu1 %539  ;;  %v903_v3 = vmax.f32 %v895_v53, 0.0 }
  0xf4   : > { %v604_v13 = vsel %vm444_vm12, %v540_v7, 0.0  ;;  %v606_v28 = vsel %vm446_vm6, %v540_v7, 0.0  ;;  %vm1224_vm12 = vcmp.eq.s32.totalorder %v1046_v15, %v2392_v33  ;;  %v605_v2 = vsel %vm445_vm5, %v540_v7, 0.0 }
  0xf5   : > { %v2838_v41 = vadd.f32 %v627_v60, %v604_v13  ;;  %v2840_v23 = vadd.f32 %v669_v1, %v606_v28  ;;  %v2842_v24 = vpop.permute.xlu0 %544  ;;  %v607_v10 = vsel %vm447_vm4, %v540_v7, 0.0  ;;  %v901_v60 = vmax.f32 %v893_v52, 0.0 }
  0xf6   : > { %v902_v1 = vmax.f32 %v2830_v29, 0.0  ;;  %v649_v36 = vadd.f32 %v648_v51, %v605_v2  ;;  %v691_v4 = vadd.f32 %v690_v54, %v607_v10  ;;  %v608_v62 = vsel %vm448_vm10, %v2842_v24, 0.0 }
  0xf7   : > { %v1097_v35 = vpop.permute.xlu1 %1096  ;;  %v609_v8 = vsel %vm449_vm13, %v2842_v24, 0.0  ;;  %v610_v12 = vsel %vm450_vm7, %v2842_v24, 0.0  ;;  %vm455_vm5 = vcmp.eq.s32.totalorder %v375_v37, %v2360_v22 }
  0xf8   : > { %vm1241_vm15 = vcmp.eq.s32.totalorder %v1097_v35, %v2392_v33  ;;  %v650_v42 = vadd.f32 %v649_v36, %v609_v8  ;;  %v671_v44 = vadd.f32 %v2840_v23, %v610_v12 }
  0xf9   : > { %vm1880_vm8 = vmpackc.low %vm1241_vm15, %vm1240_vm14  ;;  %v2853_v20 = vpop.permute.xlu0 %917  ;;  %vm451_vm14 = vcmp.eq.s32.totalorder %v2851_v19, %v2360_v22 }
  0xfa   : > { %1881 = vmatprep.subr.msk.bf16.mxu0 %vm1880_vm8, %v2083_v6  ;;  %vm1256_vm8 = vcmp.eq.s32.totalorder %v2832_v63, %v2392_v33  ;;  %v611_v31 = vsel %vm451_vm14, %v2842_v24, 0.0  ;;  %v924_v14 = vmul.f32 %v2853_v20, %v904_v56  ;;  %v925_v15 = vmul.f32 %v2853_v20, %v905_v30 }
  0xfb   : > { %v1193_v45 = vpop.permute.xlu1 %1192  ;;  %v926_v5 = vmul.f32 %v2853_v20, %v906_v26  ;;  %v927_v21 = vmul.f32 %v2853_v20, %v907_v9  ;;  %v629_v20 = vadd.f32 %v2838_v41, %v608_v62  ;;  %v692_v46 = vadd.f32 %v691_v4, %v611_v31 }
  0xfc   : > { %vm1273_vm3 = vcmp.eq.s32.totalorder %v1193_v45, %v2392_v33 }
  0xfd   : > { %vm1912_vm11 = vmpackc.low %vm1273_vm3, %vm1272_vm2  ;;  %v2878_v40 = vpop.permute.xlu0 %1099  ;;  %vm453_vm2 = vcmp.eq.s32.totalorder %v375_v37, %v2346_v17  ;;  %vm454_vm3 = vcmp.eq.s32.totalorder %v375_v37, %v2349_v18 }
  0xfe   : > { %1913 = vmatprep.subr.msk.bf16.mxu1 %vm1912_vm11, %v2083_v6  ;;  %vm1242_vm4 = vcmp.eq.s32.totalorder %v2878_v40, %v2392_v33 }
  0xff   : > { %v1049_v50 = vpop.permute.xlu1 %1048 }
 0x100   : > { %vm1225_vm6 = vcmp.eq.s32.totalorder %v1049_v50, %v2392_v33 }
 0x101   : > { %vm1882_vm15 = vmpackc.low %vm1225_vm6, %vm1224_vm12  ;;  %v2901_v39 = vpop.permute.xlu0 %1195 }
 0x102   : > { %1883 = vmatpush3.bf16.msk.msra.mxu0 %vm1882_vm15, %v2083_v6  ;;  %vm1274_vm10 = vcmp.eq.s32.totalorder %v2901_v39, %v2392_v33 }
 0x103   : > { %v1145_v57 = vpop.permute.xlu1 %1144 }
 0x104   : > { %vm1257_vm0 = vcmp.eq.s32.totalorder %v1145_v57, %v2392_v33 }
 0x105   : > { %vm1914_vm1 = vmpackc.low %vm1257_vm0, %vm1256_vm8  ;;  %v2918_v61 = vpop.permute.xlu0 %1051 }
 0x106   : > { %1915 = vmatpush3.bf16.msk.msra.mxu1 %vm1914_vm1, %v2083_v6  ;;  %vm1226_vm7 = vcmp.eq.s32.totalorder %v2918_v61, %v2392_v33 }
 0x107   : > { %v913_v25 = vpop.permute.xlu1 %912 }
 0x108   : > { %v920_v29 = vmul.f32 %v913_v25, %v900_v59  ;;  %v921_v63 = vmul.f32 %v913_v25, %v901_v60  ;;  %v922_v7 = vmul.f32 %v913_v25, %v902_v1  ;;  %v923_v13 = vmul.f32 %v913_v25, %v903_v3 }
 0x109   : > { %v2941_v28 = vpop.permute.xlu0 %1147 }
 0x10a   : > { %v928_v24 = vadd.f32 %v924_v14, %v920_v29  ;;  %v935_v35 = vadd.f32 %v925_v15, %v921_v63  ;;  %v942_v38 = vadd.f32 %v926_v5, %v922_v7  ;;  %v949_v19 = vadd.f32 %v927_v21, %v923_v13 }
 0x10b   : > { %v550_v55 = vpop.permute.xlu1 %549  ;;  %vm1258_vm8 = vcmp.eq.s32.totalorder %v2941_v28, %v2392_v33 }
 0x10c   : > { %v929_v16 = vrot.slane %v928_v24, 4  ;;  %v612_v17 = vsel %vm452_vm9, %v550_v55, 0.0  ;;  %v613_v45 = vsel %vm453_vm2, %v550_v55, 0.0  ;;  %v614_v18 = vsel %vm454_vm3, %v550_v55, 0.0 }
 0x10d   : > { %v615_v47 = vsel %vm455_vm5, %v550_v55, 0.0  ;;  %v630_v22 = vadd.f32 %v629_v20, %v612_v17  ;;  %v651_v32 = vadd.f32 %v650_v42, %v613_v45  ;;  %v2951_v0 = vpop.permute.xlu0 %1105  ;;  %v943_v27 = vrot.slane %v942_v38, 4 }
 0x10e   : > { %v930_v11 = vadd.f32 %v929_v16, %v928_v24  ;;  %v672_v41 = vadd.f32 %v671_v44, %v614_v18  ;;  %v693_v43 = vadd.f32 %v692_v46, %v615_v47  ;;  %v936_v58 = vrot.slane %v935_v35, 4 }
 0x10f   : > { %v631_v23 = vrot.slane %v630_v22, 4  ;;  %v1103_v48 = vpop.permute.xlu1 %1102  ;;  %v652_v49 = vrot.slane %v651_v32, 4  ;;  %v950_v52 = vrot.slane %v949_v19, 4  ;;  %v944_v10 = vadd.f32 %v943_v27, %v942_v38 }
 0x110   : > { %v673_v50 = vrot.slane %v672_v41, 4  ;;  %vm1243_vm11 = vcmp.eq.s32.totalorder %v1103_v48, %v2392_v33  ;;  %v694_v34 = vrot.slane %v693_v43, 4  ;;  %v937_v54 = vadd.f32 %v936_v58, %v935_v35 }
 0x111   : > { %v632_v53 = vadd.f32 %v631_v23, %v630_v22  ;;  %vm1884_vm13 = vmpackc.low %vm1243_vm11, %vm1242_vm4  ;;  %v2959_v37 = vpop.permute.xlu0 %1201  ;;  %v653_v51 = vadd.f32 %v652_v49, %v651_v32  ;;  %v931_v2 = vrot.slane %v930_v11, 2  ;;  %v951_v26 = vadd.f32 %v950_v52, %v949_v19 }
 0x112   : > { %v674_v56 = vadd.f32 %v673_v50, %v672_v41  ;;  %1885 = vmatprep.subr.msk.bf16.mxu0 %vm1884_vm13, %v2083_v6  ;;  %v695_v30 = vadd.f32 %v694_v34, %v693_v43  ;;  %v938_v59 = vrot.slane %v937_v54, 2  ;;  %v945_v20 = vrot.slane %v944_v10, 2 }
 0x113   : > { %v1199_v9 = vpop.permute.xlu1 %1198  ;;  %v654_v57 = vrot.slane %v653_v51, 2  ;;  %v633_v60 = vrot.slane %v632_v53, 2  ;;  %v932_v1 = vadd.f32 %v931_v2, %v930_v11  ;;  %v952_v3 = vrot.slane %v951_v26, 2 }
 0x114   : > { %vm1275_vm12 = vcmp.eq.s32.totalorder %v1199_v9, %v2392_v33  ;;  %v696_v40 = vrot.slane %v695_v30, 2  ;;  %v675_v36 = vrot.slane %v674_v56, 2  ;;  %v939_v8 = vadd.f32 %v938_v59, %v937_v54 }
 0x115   : > { %vm1916_vm6 = vmpackc.low %vm1275_vm12, %vm1274_vm10  ;;  %v1058_v4 = vpop.permute.xlu0 %1057  ;;  %v655_v62 = vadd.f32 %v654_v57, %v653_v51  ;;  %v634_v12 = vadd.f32 %v633_v60, %v632_v53  ;;  %v933_v31 = vrot.slane %v932_v1, 1  ;;  %v953_v15 = vadd.f32 %v952_v3, %v951_v26 }
 0x116   : > { %1917 = vmatprep.subr.msk.bf16.mxu1 %vm1916_vm6, %v2083_v6  ;;  %v697_v14 = vadd.f32 %v696_v40, %v695_v30  ;;  %v676_v5 = vadd.f32 %v675_v36, %v674_v56  ;;  %v940_v29 = vrot.slane %v939_v8, 1  ;;  %v946_v17 = vadd.f32 %v945_v20, %v944_v10 }
 0x117   : > { %v1055_v21 = vpop.permute.xlu1 %1054  ;;  %v656_v25 = vrot.slane %v655_v62, 1  ;;  %v635_v63 = vrot.slane %v634_v12, 1  ;;  %v934_v7 = vadd.f32 %v933_v31, %v932_v1  ;;  %v954_v13 = vrot.slane %v953_v15, 1 }
 0x118   : > { %vm1227_vm14 = vcmp.eq.s32.totalorder %v1055_v21, %v2392_v33  ;;  %v698_v39 = vrot.slane %v697_v14, 1  ;;  %v677_v24 = vrot.slane %v676_v5, 1  ;;  %v941_v19 = vadd.f32 %v940_v29, %v939_v8 }
 0x119   : > { %vm1886_vm15 = vmpackc.low %vm1227_vm14, %vm1226_vm7  ;;  %v1154_v35 = vpop.permute.xlu0 %1153  ;;  %v657_v38 = vadd.f32 %v656_v25, %v655_v62  ;;  %v636_v61 = vadd.f32 %v635_v63, %v634_v12  ;;  %v955_v44 = vadd.f32 %v954_v13, %v953_v15  ;;  %v947_v47 = vrot.slane %v946_v17, 1 }
 0x11a   : > { %1887 = vmatpush3.bf16.msk.msra.mxu0 %vm1886_vm15, %v2083_v6  ;;  %v699_v42 = vadd.f32 %v698_v39, %v697_v14  ;;  %v678_v18 = vadd.f32 %v677_v24, %v676_v5  ;;  %vm1244_vm9 = vcmp.eq.s32.totalorder %v2951_v0, %v2392_v33  ;;  %vm1276_vm5 = vcmp.eq.s32.totalorder %v2959_v37, %v2392_v33 }
 0x11b   : > { %v1151_v46 = vpop.permute.xlu1 %1150  ;;  %v957_v55 = vadd.f32 %v941_v19, %v657_v38  ;;  %v2971_v16 = vadd.f32 %v934_v7, %v636_v61  ;;  %v948_v11 = vadd.f32 %v947_v47, %v946_v17  ;;  %vm1228_vm11 = vcmp.eq.s32.totalorder %v1058_v4, %v2392_v33 }
 0x11c   : > { %vm1259_vm0 = vcmp.eq.s32.totalorder %v1151_v46, %v2392_v33  ;;  %v959_v45 = vadd.f32 %v955_v44, %v699_v42  ;;  %vm1260_vm6 = vcmp.eq.s32.totalorder %v1154_v35, %v2392_v33 }
 0x11d   : > { %vm1918_vm1 = vmpackc.low %vm1259_vm0, %vm1258_vm8  ;;  %1475 = vmatprep.mubr.f32.mxu0 %v957_v55  ;;  %v1112_v22 = vpop.permute.xlu0 %1111  ;;  %v2980_v28 = vadd.f32 %v948_v11, %v678_v18 }
 0x11e   : > { %1545 = vmatprep.mubr.f32.mxu1 %v959_v45  ;;  %1919 = vmatpush3.bf16.msk.msra.mxu1 %vm1918_vm1, %v2083_v6  ;;  %vm1246_vm15 = vcmp.eq.s32.totalorder %v1112_v22, %v2392_v33 }
 0x11f   : > { %v1109_v32 = vpop.permute.xlu1 %1108 }
 0x120   : > { %vm1245_vm2 = vcmp.eq.s32.totalorder %v1109_v32, %v2392_v33 }
 0x121   : > { %vm1888_vm3 = vmpackc.low %vm1245_vm2, %vm1244_vm9  ;;  %v1208_v41 = vpop.permute.xlu0 %1207 }
 0x122   : > { %1889 = vmatprep.subr.msk.bf16.mxu0 %vm1888_vm3, %v2083_v6  ;;  %vm1278_vm1 = vcmp.eq.s32.totalorder %v1208_v41, %v2392_v33 }
 0x123   : > { %v1205_v27 = vpop.permute.xlu1 %1204 }
 0x124   : > { %vm1277_vm4 = vcmp.eq.s32.totalorder %v1205_v27, %v2392_v33 }
 0x125   : > { %vm1920_vm10 = vmpackc.low %vm1277_vm4, %vm1276_vm5  ;;  %v1064_v0 = vpop.permute.xlu0 %1063 }
 0x126   : > { %1921 = vmatprep.subr.msk.bf16.mxu1 %vm1920_vm10, %v2083_v6  ;;  %vm1230_vm3 = vcmp.eq.s32.totalorder %v1064_v0, %v2392_v33 }
 0x127   : > { %v1061_v43 = vpop.permute.xlu1 %1060 }
 0x128   : > { %vm1229_vm13 = vcmp.eq.s32.totalorder %v1061_v43, %v2392_v33 }
 0x129   : > { %vm1890_vm12 = vmpackc.low %vm1229_vm13, %vm1228_vm11  ;;  %v1160_v49 = vpop.permute.xlu0 %1159 }
 0x12a   : > { %1891 = vmatpush3.bf16.msk.msra.mxu0 %vm1890_vm12, %v2083_v6  ;;  %vm1262_vm10 = vcmp.eq.s32.totalorder %v1160_v49, %v2392_v33 }
 0x12b   : > { %v1157_v23 = vpop.permute.xlu1 %1156 }
 0x12c   : > { %vm1261_vm7 = vcmp.eq.s32.totalorder %v1157_v23, %v2392_v33 }
 0x12d   : > { %vm1922_vm14 = vmpackc.low %vm1261_vm7, %vm1260_vm6  ;;  %v1118_v50 = vpop.permute.xlu0 %1117 }
 0x12e   : > { %1923 = vmatpush3.bf16.msk.msra.mxu1 %vm1922_vm14, %v2083_v6  ;;  %vm1248_vm12 = vcmp.eq.s32.totalorder %v1118_v50, %v2392_v33 }
 0x12f   : > { %v1115_v48 = vpop.permute.xlu1 %1114 }
 0x130   : > { %vm1247_vm8 = vcmp.eq.s32.totalorder %v1115_v48, %v2392_v33 }
 0x131   : > { %vm1892_vm0 = vmpackc.low %vm1247_vm8, %vm1246_vm15  ;;  %v1214_v53 = vpop.permute.xlu0 %1213 }
 0x132   : > { %1893 = vmatprep.subr.msk.bf16.mxu0 %vm1892_vm0, %v2083_v6  ;;  %vm1280_vm14 = vcmp.eq.s32.totalorder %v1214_v53, %v2392_v33 }
 0x133   : > { %v1211_v58 = vpop.permute.xlu1 %1210 }
 0x134   : > { %vm1279_vm9 = vcmp.eq.s32.totalorder %v1211_v58, %v2392_v33 }
 0x135   : > { %vm1924_vm2 = vmpackc.low %vm1279_vm9, %vm1278_vm1  ;;  %v1070_v51 = vpop.permute.xlu0 %1069 }
 0x136   : > { %1925 = vmatprep.subr.msk.bf16.mxu1 %vm1924_vm2, %v2083_v6  ;;  %vm1232_vm0 = vcmp.eq.s32.totalorder %v1070_v51, %v2392_v33 }
 0x137   : > { %v1067_v34 = vpop.permute.xlu1 %1066 }
 0x138   : > { %vm1231_vm5 = vcmp.eq.s32.totalorder %v1067_v34, %v2392_v33 }
 0x139   : > { %vm1894_vm4 = vmpackc.low %vm1231_vm5, %vm1230_vm3  ;;  %v1166_v10 = vpop.permute.xlu0 %1165 }
 0x13a   : > { %1895 = vmatpush3.bf16.msk.msra.mxu0 %vm1894_vm4, %v2083_v6  ;;  %vm1264_vm2 = vcmp.eq.s32.totalorder %v1166_v10, %v2392_v33 }
 0x13b   : > { %v1163_v52 = vpop.permute.xlu1 %1162 }
 0x13c   : > { %vm1263_vm11 = vcmp.eq.s32.totalorder %v1163_v52, %v2392_v33 }
 0x13d   : > { %vm1926_vm13 = vmpackc.low %vm1263_vm11, %vm1262_vm10 }
 0x13e   : > { %1927 = vmatpush3.bf16.msk.msra.mxu1 %vm1926_vm13, %v2083_v6 }
 0x13f   : > { %v1121_v37 = vpop.permute.xlu1 %1120 }
 0x140   : > { %vm1249_vm6 = vcmp.eq.s32.totalorder %v1121_v37, %v2392_v33 }
 0x141   : > { %vm1896_vm7 = vmpackc.low %vm1249_vm6, %vm1248_vm12 }
 0x142   : > { %1897 = vmatprep.subr.msk.bf16.mxu0 %vm1896_vm7, %v2083_v6 }
 0x143   : > { %v1217_v54 = vpop.permute.xlu1 %1216 }
 0x144   : > { %vm1281_vm15 = vcmp.eq.s32.totalorder %v1217_v54, %v2392_v33 }
 0x145   : > { %vm1928_vm8 = vmpackc.low %vm1281_vm15, %vm1280_vm14 }
 0x146   : > { %1929 = vmatprep.subr.msk.bf16.mxu1 %vm1928_vm8, %v2083_v6 }
 0x147   : > { %v1073_v2 = vpop.permute.xlu1 %1072 }
 0x148   : > { %vm1233_vm1 = vcmp.eq.s32.totalorder %v1073_v2, %v2392_v33 }
 0x149   : > { %vm1898_vm9 = vmpackc.low %vm1233_vm1, %vm1232_vm0 }
 0x14a   : > { %1899 = vmatpush3.bf16.msk.msra.mxu0 %vm1898_vm9, %v2083_v6 }
 0x14b   : > { %v1169_v56 = vpop.permute.xlu1 %1168 }
 0x14c   : > { %vm1265_vm3 = vcmp.eq.s32.totalorder %v1169_v56, %v2392_v33 }
 0x14d   : > { %vm1930_vm5 = vmpackc.low %vm1265_vm3, %vm1264_vm2  ;;  %1476 = vmatmul.mubr.f32.vlgmr.msra.gmra.mrb[0].mxu0 %v2971_v16 }
 0x14e   : > { %1931 = vmatpush3.bf16.msk.msra.mxu1 %vm1930_vm5, %v2083_v6 }
 0x151   : > { %1546 = vmatmul.mubr.f32.vlgmr.msra.gmra.mrb[0].mxu1 %v2980_v28 }
 0x220   : > { %v1830_v30 = vpop.f32.mrb[0].mxu0 }
 0x221   : > { %v1831_v26 = vpop.f32.mrb[1].mxu0 }
 0x222   : > { %v1832_v9 = vadd.f32 %v1831_v26, %v1830_v30 }
 0x224   : > { %v1865_v57 = vpop.f32.mrb[0].mxu1 }
 0x225   : > { %v1866_v59 = vpop.f32.mrb[1].mxu1 }
 0x226   : > { %v1867_v60 = vadd.f32 %v1866_v59, %v1865_v57 }
 0x228   : > { %v1548_v33 = vadd.f32 %v1867_v60, %v1832_v9 }
 0x22a   : > { %1552 = vst [vmem:[%s329_s19] sm:$0xff] %v1548_v33 }
 0x22b   : > { %2013 = shalt.err (!%p2010_p6)
}
 0x22c   : > { %s2014_s22 = scalar_lea.hbm %s3024_s16, 128  ;;  %s2018_s8 = scalar_lea.hbm %s3078_s7, 256 }
 0x22d   : > { %p2015_p7 = scmp.ne.s32.totalorder %s3024_s16, %s2014_s22  ;;  %p2019_p11 = scmp.lt.u32.totalorder %s3024_s16, %s3078_s7 }
 0x22e   : > { %p2020_p12 = scmp.lt.u32.totalorder %s2018_s8, %s2014_s22  ;;  %p2022_p0 = scmp.lt.u32.totalorder %s2014_s22, %s3024_s16 }
 0x22f   : > { %p2016_p9 = pnand %p2015_p7, %p2165_p4 }
 0x230   : > { %p2021_p13 = por %p2020_p12, %p2019_p11 }
 0x231   : > { %p2017_p10 = pneg %p2016_p9 }
 0x232   : > { %p2023_p1 = por %p2022_p0, %p2021_p13 }
 0x234   : > { %p2024_p2 = pnand %p2023_p1, %p2017_p10 }
 0x236   : > { %2027 = shalt.err (!%p2024_p2)
}
 0x237   : > { %1932 = dma.vmem_to_hbm [thread:$0]  (%p2165_p4), %s3026_s10, 128, %s3024_s16, %s1554_s17  }
 0x238 PF: > { %p1938_p3 = scmp.ge.s32.totalorder %s2078_s29, 2  ;;  %s1579_s15 = sand.u32 1, %s2058_s24  }
 0x239   : > { %s1580_s18 = scalar_lea.sflag [#allocation3], %s1579_s15 }
 0x23a   : > { %p1935_p5 = pnand %p1938_p3, %p2172_p8 }
 0x23c   : > { %2053 = dma.done.wait (!%p1935_p5), %s1580_s18, 128  }
 0x23d   : > { %2055 = vsyncadd (!%p1935_p5), %s1580_s18, 4294967168  ;;  %s20_s29 = sadd.s32 1, %s2078_s29   ;;  %s3097_s24 = smov %s2062_s25 }
 0x23e   : > { %p17_p6 = scmp.ge.s32.totalorder %s20_s29, 4   ;;  %s3098_s25 = smov %s2066_s26 }
 0x23f   : > { %s3099_s26 = smov %s2178_s14  ;;  %s3100_s27 = smov %s2074_s28 }
 0x240   : > { %s3101_s28 = smov %s3103_s9  ;;  %19 = sbr.rel (!%p17_p6) target bundleno = 4 (0x4), region = 93 }
 0x247   :  { %1585 = vsyncpa [#allocation3], 1 }
 0x248   :  { %1587 = vsyncpa [#allocation3 + $0x1], 1 }

</bundles_post_ra>
